<compile_context>
chip_gen: v6e
topology: v6e:2x2x1
jax: 0.10.0
libtpu: 0.0.40
codegen_flags: <defaults>
</compile_context>

<pallas_src>
import functools

import jax
import jax.numpy as jnp
from jax.experimental import pallas as pl
from jax.experimental.pallas import tpu as pltpu


# --------------------------------------------------------------------------
# Fused kernel
# --------------------------------------------------------------------------

def _fused_kernel(x_ref, masks_ref, w1_ref, b1_ref, w2_ref, b2_ref,
                  gamma_ref, beta_ref, o_ref,
                  xpad_ref, subpad_ref, pat1_ref, pat2_ref,
                  *, H, W, in_ch, out_ch, r, lpad):
    HW = H * W
    r2 = r * r
    crr = r2 * out_ch

    # Column-wrap masks over the flat (h*W + w) axis (precomputed in wrapper):
    #   mask_l zeroes w == 0     (taps that read column w-1)
    #   mask_r zeroes w == W-1   (taps that read column w+1)
    mask_l = masks_ref[0:1, :]                    # (1, HW)
    mask_r = masks_ref[1:2, :]                    # (1, HW)

    def tap(flat_padded, dy, dx):
        """For every output pixel p=(h,w), read pixel (h+dy, w+dx) of the
        flat, zero-padded image (dy, dx in {-1,0,1}); zero outside."""
        off = dy * W + dx
        v = flat_padded[:, lpad + off: lpad + off + HW]
        if dx == -1:
            v = v * mask_l
        elif dx == 1:
            v = v * mask_r
        return v

    # ---------------- stage 1: the two convs that read x -------------------
    # Zero-pad the flat input once in VMEM (halo handled via flat shifts).
    xpad_ref[...] = jnp.zeros_like(xpad_ref)
    xpad_ref[:, lpad:lpad + HW] = x_ref[0]        # (in_ch, HW)
    xp = xpad_ref[...]

    # im2col once: rows [t*in_ch, (t+1)*in_ch) hold tap t = ky*3 + kx.
    for ky in range(3):
        for kx in range(3):
            t = ky * 3 + kx
            pat1_ref[t * in_ch:(t + 1) * in_ch, :] = tap(xp, ky - 1, kx - 1)

    # One matmul for BOTH branches: w1 = [subpel ; upsample] along Cout.
    s1 = jnp.dot(w1_ref[...], pat1_ref[...],
                 preferred_element_type=jnp.float32) + b1_ref[...]   # (2*crr, HW)

    sub = s1[:crr, :]                              # main branch (phase-major rows)
    idn = s1[crr:, :]                              # identity branch
    # LeakyReLU(0.01) commutes with PixelShuffle -> apply before the shuffle.
    sub = jnp.where(sub > 0, sub, jnp.float32(0.01) * sub)

    # -------- stage 2: conv3x3 on the pixel-shuffled main branch -----------
    # Rows of `sub` are ordered [phase phi = i*r+j][channel c]; the conv on
    # the upsampled image is a sub-pixel convolution reading shifted planes of
    # `sub` -- one matmul for all r^2 output phases, the shuffle itself is
    # never materialised.
    subpad_ref[...] = jnp.zeros_like(subpad_ref)
    for phi in range(r2):
        subpad_ref[phi, :, lpad:lpad + HW] = sub[phi * out_ch:(phi + 1) * out_ch, :]

    cache = {}

    def shifted_plane(phi_src, du, dv):
        key = (phi_src, du, dv)
        if key not in cache:
            cache[key] = tap(subpad_ref[phi_src], du, dv)
        return cache[key]

    for a_ph in range(r):               # output row phase (hs % r)
        for b_ph in range(r):           # output col phase (ws % r)
            phi_out = a_ph * r + b_ph
            col0 = phi_out * HW
            for ky in range(3):
                ip, du = (a_ph + ky - 1) % r, (a_ph + ky - 1) // r
                for kx in range(3):
                    jp, dv = (b_ph + kx - 1) % r, (b_ph + kx - 1) // r
                    t = ky * 3 + kx
                    pat2_ref[t * out_ch:(t + 1) * out_ch, col0:col0 + HW] = (
                        shifted_plane(ip * r + jp, du, dv))

    o2 = jnp.dot(w2_ref[...], pat2_ref[...],
                 preferred_element_type=jnp.float32) + b2_ref[...]   # (out_ch, r2*HW)

    # --------------- stage 3: inverse GDN + residual add -------------------
    # IGDN is purely per-pixel, so it is layout-agnostic:
    #   y = x * sqrt(beta + gamma @ x^2)
    norm = jnp.dot(gamma_ref[...], o2 * o2,
                   preferred_element_type=jnp.float32) + beta_ref[...]
    norm = jnp.maximum(norm, jnp.float32(0.0))     # robustness guard for sqrt
    y = o2 * jnp.sqrt(norm)

    for phi in range(r2):
        o_ref[0, phi * out_ch:(phi + 1) * out_ch, :] = (
            y[:, phi * HW:(phi + 1) * HW]
            + idn[phi * out_ch:(phi + 1) * out_ch, :]).astype(o_ref.dtype)


# --------------------------------------------------------------------------
# Wrapper (parameter re-layout + pallas_call + final un-shuffle)
# --------------------------------------------------------------------------

def _flatten_conv_weight(w):
    """(Cout, Cin, 3, 3) torch layout -> (Cout, 9*Cin), k = (ky*3+kx)*Cin + ci."""
    cout = w.shape[0]
    return jnp.transpose(w, (0, 2, 3, 1)).reshape(cout, -1)


def residual_block_upsample(x, params, r=2):
    """x: (N, in_ch, H, W) NCHW (same as the PyTorch module).  Returns NCHW."""
    N, in_ch, H, W = x.shape
    out_ch = params["w_conv"].shape[0]
    r2 = r * r
    crr = r2 * out_ch
    HW = H * W
    lpad = W + 1                        # halo reach of one 3x3 tap in flat index

    # --- parameter re-layout (tiny, XLA setup) ------------------------------
    # Phase-major permutation of the r^2-expanded output channels:
    #   new row rho = phi*out_ch + c   <-   torch channel  c*r^2 + phi
    rho = jnp.arange(crr)
    old = (rho % out_ch) * r2 + rho // out_ch
    w1 = jnp.concatenate([_flatten_conv_weight(params["w_subpel"][old]),
                          _flatten_conv_weight(params["w_up"][old])], axis=0)
    b1 = jnp.concatenate([params["b_subpel"][old],
                          params["b_up"][old]], axis=0).reshape(2 * crr, 1)
    w2 = _flatten_conv_weight(params["w_conv"])                 # (out_ch, 9*out_ch)
    b2 = params["b_conv"].reshape(out_ch, 1)
    gamma = params["gdn_gamma"]                                 # (out_ch, out_ch)
    beta = params["gdn_beta"].reshape(out_ch, 1)

    # Column-wrap masks over the flat spatial axis (shared by both convs).
    col = jnp.arange(HW, dtype=jnp.int32) % W
    masks = jnp.stack([col != 0, col != W - 1]).astype(jnp.float32)   # (2, HW)

    x_flat = x.reshape(N, in_ch, HW)

    kernel = functools.partial(_fused_kernel, H=H, W=W, in_ch=in_ch,
                               out_ch=out_ch, r=r, lpad=lpad)

    out_phase = pl.pallas_call(
        kernel,
        out_shape=jax.ShapeDtypeStruct((N, crr, HW), x.dtype),
        grid=(N,),
        in_specs=[
            pl.BlockSpec((1, in_ch, HW), lambda n: (n, 0, 0)),        # x
            pl.BlockSpec((2, HW), lambda n: (0, 0)),                  # masks
            pl.BlockSpec((2 * crr, 9 * in_ch), lambda n: (0, 0)),     # w1
            pl.BlockSpec((2 * crr, 1), lambda n: (0, 0)),             # b1
            pl.BlockSpec((out_ch, 9 * out_ch), lambda n: (0, 0)),     # w2
            pl.BlockSpec((out_ch, 1), lambda n: (0, 0)),              # b2
            pl.BlockSpec((out_ch, out_ch), lambda n: (0, 0)),         # gamma
            pl.BlockSpec((out_ch, 1), lambda n: (0, 0)),              # beta
        ],
        out_specs=pl.BlockSpec((1, crr, HW), lambda n: (n, 0, 0)),
        scratch_shapes=[
            pltpu.VMEM((in_ch, HW + 2 * lpad), jnp.float32),          # padded x
            pltpu.VMEM((r2, out_ch, HW + 2 * lpad), jnp.float32),     # padded sub planes
            pltpu.VMEM((9 * in_ch, HW), jnp.float32),                 # im2col conv1
            pltpu.VMEM((9 * out_ch, r2 * HW), jnp.float32),           # im2col conv2
        ],
        compiler_params=pltpu.CompilerParams(
            dimension_semantics=("parallel",)),     # batch split across cores
    )(x_flat, masks, w1, b1, w2, b2, gamma, beta)

    # Un-shuffle the phase-separated output (N, (a,b,c), u*W+v) back to NCHW.
    # This is the only op outside the kernel: a free reshape/transpose of the
    # tiny final tensor, fused by XLA.
    out = out_phase.reshape(N, r, r, out_ch, H, W)
    out = out.transpose(0, 3, 4, 1, 5, 2).reshape(N, out_ch, H * r, W * r)
    return out


# --------------------------------------------------------------------------
# Parameters (torch layout) and pure-JAX reference for validation
# --------------------------------------------------------------------------

def init_params(key, in_ch, out_ch, r):
    ks = jax.random.split(key, 7)
    crr = out_ch * r * r
    s1 = 1.0 / (3.0 * jnp.sqrt(float(in_ch)))
    s2 = 1.0 / (3.0 * jnp.sqrt(float(out_ch)))
    return {
        "w_subpel": s1 * jax.random.normal(ks[0], (crr, in_ch, 3, 3), jnp.float32),
        "b_subpel": 0.05 * jax.random.normal(ks[1], (crr,), jnp.float32),
        "w_conv":   s2 * jax.random.normal(ks[2], (out_ch, out_ch, 3, 3), jnp.float32),
        "b_conv":   0.05 * jax.random.normal(ks[3], (out_ch,), jnp.float32),
        # GDN(inverse=True): values after CompressAI's non-negative reparam.
        "gdn_beta": jnp.ones((out_ch,), jnp.float32),
        "gdn_gamma": 0.1 * jnp.eye(out_ch, dtype=jnp.float32)
                     + 0.01 * jax.random.uniform(ks[4], (out_ch, out_ch), jnp.float32),
        "w_up":     s1 * jax.random.normal(ks[5], (crr, in_ch, 3, 3), jnp.float32),
        "b_up":     0.05 * jax.random.normal(ks[6], (crr,), jnp.float32),
    }


def _ref_forward(x, params, r):
    def conv3x3(x, w, b):
        y = jax.lax.conv_general_dilated(
            x, w, window_strides=(1, 1), padding=((1, 1), (1, 1)),
            dimension_numbers=("NCHW", "OIHW", "NCHW"))
        return y + b[None, :, None, None]

    def pixel_shuffle(x, r):
        N, crr, H, W = x.shape
        C = crr // (r * r)
        x = x.reshape(N, C, r, r, H, W)
        x = x.transpose(0, 1, 4, 2, 5, 3)
        return x.reshape(N, C, H * r, W * r)

    out = conv3x3(x, params["w_subpel"], params["b_subpel"])
    out = pixel_shuffle(out, r)
    out = jnp.where(out > 0, out, 0.01 * out)              # LeakyReLU(0.01)
    out = conv3x3(out, params["w_conv"], params["b_conv"])
    norm = jnp.einsum("ck,nkhw->nchw", params["gdn_gamma"], out * out)
    out = out * jnp.sqrt(params["gdn_beta"][None, :, None, None] + norm)
    identity = pixel_shuffle(conv3x3(x, params["w_up"], params["b_up"]), r)
    return out + identity


# --------------------------------------------------------------------------
# main
# --------------------------------------------------------------------------

if __name__ == "__main__":
    key = jax.random.PRNGKey(0)
    kx, kp = jax.random.split(key)

    N, in_ch, out_ch, H, W, r = 2, 4, 4, 16, 16, 2
    x = jax.random.normal(kx, (N, in_ch, H, W), jnp.float32)
    params = init_params(kp, in_ch, out_ch, r)

    fwd = jax.jit(functools.partial(residual_block_upsample, r=r))
    y = jax.block_until_ready(fwd(x, params))
    assert y.shape == (N, out_ch, H * r, W * r), y.shape
    assert bool(jnp.all(jnp.isfinite(y))), "non-finite output"

    # Correctness check against a pure-JAX reference.  Tolerance is loose
    # because matmul precision (MXU passes) may differ between the two paths;
    # genuine indexing/layout bugs produce O(1) errors.
    y_ref = jax.block_until_ready(_ref_forward(x, params, r))
    err = float(jnp.max(jnp.abs(y - y_ref)))
    assert err < 1e-1, f"mismatch vs reference: max abs err = {err}"

    print("KERNEL_OK")
</pallas_src>

<mosaic_0001>
module attributes {stable_mosaic.version = 11 : i64} {
  func.func @_fused_kernel(%arg0: i32, %arg1: memref<1x4x256xf32, #tpu.memory_space<vmem>>, %arg2: memref<2x256xf32, #tpu.memory_space<vmem>>, %arg3: memref<32x36xf32, #tpu.memory_space<vmem>>, %arg4: memref<32x1xf32, #tpu.memory_space<vmem>>, %arg5: memref<4x36xf32, #tpu.memory_space<vmem>>, %arg6: memref<4x1xf32, #tpu.memory_space<vmem>>, %arg7: memref<4x4xf32, #tpu.memory_space<vmem>>, %arg8: memref<4x1xf32, #tpu.memory_space<vmem>>, %arg9: memref<1x16x256xf32, #tpu.memory_space<vmem>>, %arg10: memref<4x290xf32, #tpu.memory_space<vmem>>, %arg11: memref<4x4x290xf32, #tpu.memory_space<vmem>>, %arg12: memref<36x256xf32, #tpu.memory_space<vmem>>, %arg13: memref<36x1024xf32, #tpu.memory_space<vmem>>) attributes {dimension_semantics = [#tpu.dimension_semantics<parallel>], iteration_bounds = array<i64: 2>, scalar_prefetch = 0 : i64, scratch_operands = 4 : i64, tpu.core_type = #tpu.core_type<tc>, window_params = [{transform_indices = @transform_0, window_bounds = array<i64: 1, 4, 256>}, {pipeline_mode = #tpu.pipeline_mode<synchronous>, transform_indices = @transform_1, window_bounds = array<i64: 2, 256>}, {pipeline_mode = #tpu.pipeline_mode<synchronous>, transform_indices = @transform_2, window_bounds = array<i64: 32, 36>}, {pipeline_mode = #tpu.pipeline_mode<synchronous>, transform_indices = @transform_3, window_bounds = array<i64: 32, 1>}, {pipeline_mode = #tpu.pipeline_mode<synchronous>, transform_indices = @transform_4, window_bounds = array<i64: 4, 36>}, {pipeline_mode = #tpu.pipeline_mode<synchronous>, transform_indices = @transform_5, window_bounds = array<i64: 4, 1>}, {pipeline_mode = #tpu.pipeline_mode<synchronous>, transform_indices = @transform_6, window_bounds = array<i64: 4, 4>}, {pipeline_mode = #tpu.pipeline_mode<synchronous>, transform_indices = @transform_7, window_bounds = array<i64: 4, 1>}, {transform_indices = @transform_8, window_bounds = array<i64: 1, 16, 256>}]} {
    %c0 = arith.constant 0 : index
    %c0_0 = arith.constant 0 : index
    %0 = vector.load %arg2[%c0, %c0_0] : memref<2x256xf32, #tpu.memory_space<vmem>>, vector<1x256xf32>
    %c1 = arith.constant 1 : index
    %c0_1 = arith.constant 0 : index
    %1 = vector.load %arg2[%c1, %c0_1] : memref<2x256xf32, #tpu.memory_space<vmem>>, vector<1x256xf32>
    %cst = arith.constant 0.000000e+00 : f32
    %2 = vector.broadcast %cst : f32 to vector<4x290xf32>
    %c0_2 = arith.constant 0 : index
    %c0_3 = arith.constant 0 : index
    %3 = vector.load %arg10[%c0_2, %c0_3] : memref<4x290xf32, #tpu.memory_space<vmem>>, vector<4x290xf32>
    tpu.vector_store %arg10[%c0_2, %c0_3], %2 {strides = array<i32>} : memref<4x290xf32, #tpu.memory_space<vmem>>, vector<4x290xf32>,
    %c0_4 = arith.constant 0 : index
    %c0_5 = arith.constant 0 : index
    %c0_6 = arith.constant 0 : index
    %4 = vector.load %arg1[%c0_4, %c0_5, %c0_6] : memref<1x4x256xf32, #tpu.memory_space<vmem>>, vector<1x4x256xf32>
    %5 = vector.shape_cast %4 : vector<1x4x256xf32> to vector<4x256xf32>
    %c0_7 = arith.constant 0 : index
    %c17 = arith.constant 17 : index
    %6 = vector.load %arg10[%c0_7, %c17] : memref<4x290xf32, #tpu.memory_space<vmem>>, vector<4x256xf32>
    tpu.vector_store %arg10[%c0_7, %c17], %5 {strides = array<i32>} : memref<4x290xf32, #tpu.memory_space<vmem>>, vector<4x256xf32>,
    %c0_8 = arith.constant 0 : index
    %c0_9 = arith.constant 0 : index
    %7 = vector.load %arg10[%c0_8, %c0_9] : memref<4x290xf32, #tpu.memory_space<vmem>>, vector<4x290xf32>
    %8 = vector.extract_strided_slice %7 {offsets = [0, 0], sizes = [4, 256], strides = [1, 1]} : vector<4x290xf32> to vector<4x256xf32>
    %9 = vector.broadcast %0 : vector<1x256xf32> to vector<4x256xf32>
    %10 = arith.mulf %8, %9 : vector<4x256xf32>
    %c0_10 = arith.constant 0 : index
    %c0_11 = arith.constant 0 : index
    %11 = vector.load %arg12[%c0_10, %c0_11] : memref<36x256xf32, #tpu.memory_space<vmem>>, vector<4x256xf32>
    tpu.vector_store %arg12[%c0_10, %c0_11], %10 {strides = array<i32>} : memref<36x256xf32, #tpu.memory_space<vmem>>, vector<4x256xf32>,
    %12 = vector.extract_strided_slice %7 {offsets = [0, 1], sizes = [4, 256], strides = [1, 1]} : vector<4x290xf32> to vector<4x256xf32>
    %c4 = arith.constant 4 : index
    %c0_12 = arith.constant 0 : index
    %13 = vector.load %arg12[%c4, %c0_12] : memref<36x256xf32, #tpu.memory_space<vmem>>, vector<4x256xf32>
    tpu.vector_store %arg12[%c4, %c0_12], %12 {strides = array<i32>} : memref<36x256xf32, #tpu.memory_space<vmem>>, vector<4x256xf32>,
    %14 = vector.extract_strided_slice %7 {offsets = [0, 2], sizes = [4, 256], strides = [1, 1]} : vector<4x290xf32> to vector<4x256xf32>
    %15 = vector.broadcast %1 : vector<1x256xf32> to vector<4x256xf32>
    %16 = arith.mulf %14, %15 : vector<4x256xf32>
    %c8 = arith.constant 8 : index
    %c0_13 = arith.constant 0 : index
    %17 = vector.load %arg12[%c8, %c0_13] : memref<36x256xf32, #tpu.memory_space<vmem>>, vector<4x256xf32>
    tpu.vector_store %arg12[%c8, %c0_13], %16 {strides = array<i32>} : memref<36x256xf32, #tpu.memory_space<vmem>>, vector<4x256xf32>,
    %18 = vector.extract_strided_slice %7 {offsets = [0, 16], sizes = [4, 256], strides = [1, 1]} : vector<4x290xf32> to vector<4x256xf32>
    %19 = vector.broadcast %0 : vector<1x256xf32> to vector<4x256xf32>
    %20 = arith.mulf %18, %19 : vector<4x256xf32>
    %c12 = arith.constant 12 : index
    %c0_14 = arith.constant 0 : index
    %21 = vector.load %arg12[%c12, %c0_14] : memref<36x256xf32, #tpu.memory_space<vmem>>, vector<4x256xf32>
    tpu.vector_store %arg12[%c12, %c0_14], %20 {strides = array<i32>} : memref<36x256xf32, #tpu.memory_space<vmem>>, vector<4x256xf32>,
    %22 = vector.extract_strided_slice %7 {offsets = [0, 17], sizes = [4, 256], strides = [1, 1]} : vector<4x290xf32> to vector<4x256xf32>
    %c16 = arith.constant 16 : index
    %c0_15 = arith.constant 0 : index
    %23 = vector.load %arg12[%c16, %c0_15] : memref<36x256xf32, #tpu.memory_space<vmem>>, vector<4x256xf32>
    tpu.vector_store %arg12[%c16, %c0_15], %22 {strides = array<i32>} : memref<36x256xf32, #tpu.memory_space<vmem>>, vector<4x256xf32>,
    %24 = vector.extract_strided_slice %7 {offsets = [0, 18], sizes = [4, 256], strides = [1, 1]} : vector<4x290xf32> to vector<4x256xf32>
    %25 = vector.broadcast %1 : vector<1x256xf32> to vector<4x256xf32>
    %26 = arith.mulf %24, %25 : vector<4x256xf32>
    %c20 = arith.constant 20 : index
    %c0_16 = arith.constant 0 : index
    %27 = vector.load %arg12[%c20, %c0_16] : memref<36x256xf32, #tpu.memory_space<vmem>>, vector<4x256xf32>
    tpu.vector_store %arg12[%c20, %c0_16], %26 {strides = array<i32>} : memref<36x256xf32, #tpu.memory_space<vmem>>, vector<4x256xf32>,
    %28 = vector.extract_strided_slice %7 {offsets = [0, 32], sizes = [4, 256], strides = [1, 1]} : vector<4x290xf32> to vector<4x256xf32>
    %29 = vector.broadcast %0 : vector<1x256xf32> to vector<4x256xf32>
    %30 = arith.mulf %28, %29 : vector<4x256xf32>
    %c24 = arith.constant 24 : index
    %c0_17 = arith.constant 0 : index
    %31 = vector.load %arg12[%c24, %c0_17] : memref<36x256xf32, #tpu.memory_space<vmem>>, vector<4x256xf32>
    tpu.vector_store %arg12[%c24, %c0_17], %30 {strides = array<i32>} : memref<36x256xf32, #tpu.memory_space<vmem>>, vector<4x256xf32>,
    %32 = vector.extract_strided_slice %7 {offsets = [0, 33], sizes = [4, 256], strides = [1, 1]} : vector<4x290xf32> to vector<4x256xf32>
    %c28 = arith.constant 28 : index
    %c0_18 = arith.constant 0 : index
    %33 = vector.load %arg12[%c28, %c0_18] : memref<36x256xf32, #tpu.memory_space<vmem>>, vector<4x256xf32>
    tpu.vector_store %arg12[%c28, %c0_18], %32 {strides = array<i32>} : memref<36x256xf32, #tpu.memory_space<vmem>>, vector<4x256xf32>,
    %34 = vector.extract_strided_slice %7 {offsets = [0, 34], sizes = [4, 256], strides = [1, 1]} : vector<4x290xf32> to vector<4x256xf32>
    %35 = vector.broadcast %1 : vector<1x256xf32> to vector<4x256xf32>
    %36 = arith.mulf %34, %35 : vector<4x256xf32>
    %c32 = arith.constant 32 : index
    %c0_19 = arith.constant 0 : index
    %37 = vector.load %arg12[%c32, %c0_19] : memref<36x256xf32, #tpu.memory_space<vmem>>, vector<4x256xf32>
    tpu.vector_store %arg12[%c32, %c0_19], %36 {strides = array<i32>} : memref<36x256xf32, #tpu.memory_space<vmem>>, vector<4x256xf32>,
    %c0_20 = arith.constant 0 : index
    %c0_21 = arith.constant 0 : index
    %38 = vector.load %arg3[%c0_20, %c0_21] : memref<32x36xf32, #tpu.memory_space<vmem>>, vector<32x36xf32>
    %c0_22 = arith.constant 0 : index
    %c0_23 = arith.constant 0 : index
    %39 = vector.load %arg12[%c0_22, %c0_23] : memref<36x256xf32, #tpu.memory_space<vmem>>, vector<36x256xf32>
    %cst_24 = arith.constant dense<0.000000e+00> : vector<32x256xf32>
    %40 = tpu.matmul %38, %39, %cst_24 {dimension_numbers = #tpu.dot_dimension_numbers<[1], [0], [0], [1], [0, 0, 1, 1], [], []>} : vector<32x36xf32>, vector<36x256xf32>, vector<32x256xf32> -> vector<32x256xf32>
    %c0_25 = arith.constant 0 : index
    %c0_26 = arith.constant 0 : index
    %41 = vector.load %arg4[%c0_25, %c0_26] : memref<32x1xf32, #tpu.memory_space<vmem>>, vector<32x1xf32>
    %42 = vector.broadcast %41 : vector<32x1xf32> to vector<32x256xf32>
    %43 = arith.addf %40, %42 : vector<32x256xf32>
    %44 = vector.extract_strided_slice %43 {offsets = [0, 0], sizes = [16, 256], strides = [1, 1]} : vector<32x256xf32> to vector<16x256xf32>
    %45 = vector.extract_strided_slice %43 {offsets = [16, 0], sizes = [16, 256], strides = [1, 1]} : vector<32x256xf32> to vector<16x256xf32>
    %cst_27 = arith.constant 0.000000e+00 : f32
    %46 = vector.broadcast %cst_27 : f32 to vector<16x256xf32>
    %47 = arith.cmpf ogt, %44, %46 : vector<16x256xf32>
    %cst_28 = arith.constant 0.00999999977 : f32
    %48 = vector.broadcast %cst_28 : f32 to vector<16x256xf32>
    %49 = arith.mulf %48, %44 : vector<16x256xf32>
    %50 = arith.select %47, %44, %49 : vector<16x256xi1>, vector<16x256xf32>
    %cst_29 = arith.constant 0.000000e+00 : f32
    %51 = vector.broadcast %cst_29 : f32 to vector<4x4x290xf32>
    %c0_30 = arith.constant 0 : index
    %c0_31 = arith.constant 0 : index
    %c0_32 = arith.constant 0 : index
    %52 = vector.load %arg11[%c0_30, %c0_31, %c0_32] : memref<4x4x290xf32, #tpu.memory_space<vmem>>, vector<4x4x290xf32>
    tpu.vector_store %arg11[%c0_30, %c0_31, %c0_32], %51 {strides = array<i32>} : memref<4x4x290xf32, #tpu.memory_space<vmem>>, vector<4x4x290xf32>,
    %53 = vector.extract_strided_slice %50 {offsets = [0, 0], sizes = [4, 256], strides = [1, 1]} : vector<16x256xf32> to vector<4x256xf32>
    %c0_33 = arith.constant 0 : index
    %c0_34 = arith.constant 0 : index
    %c17_35 = arith.constant 17 : index
    %54 = vector.load %arg11[%c0_33, %c0_34, %c17_35] : memref<4x4x290xf32, #tpu.memory_space<vmem>>, vector<1x4x256xf32>
    %55 = vector.shape_cast %54 : vector<1x4x256xf32> to vector<4x256xf32>
    %56 = vector.shape_cast %53 : vector<4x256xf32> to vector<1x4x256xf32>
    tpu.vector_store %arg11[%c0_33, %c0_34, %c17_35], %56 {strides = array<i32>} : memref<4x4x290xf32, #tpu.memory_space<vmem>>, vector<1x4x256xf32>,
    %57 = vector.extract_strided_slice %50 {offsets = [4, 0], sizes = [4, 256], strides = [1, 1]} : vector<16x256xf32> to vector<4x256xf32>
    %c1_36 = arith.constant 1 : index
    %c0_37 = arith.constant 0 : index
    %c17_38 = arith.constant 17 : index
    %58 = vector.load %arg11[%c1_36, %c0_37, %c17_38] : memref<4x4x290xf32, #tpu.memory_space<vmem>>, vector<1x4x256xf32>
    %59 = vector.shape_cast %58 : vector<1x4x256xf32> to vector<4x256xf32>
    %60 = vector.shape_cast %57 : vector<4x256xf32> to vector<1x4x256xf32>
    tpu.vector_store %arg11[%c1_36, %c0_37, %c17_38], %60 {strides = array<i32>} : memref<4x4x290xf32, #tpu.memory_space<vmem>>, vector<1x4x256xf32>,
    %61 = vector.extract_strided_slice %50 {offsets = [8, 0], sizes = [4, 256], strides = [1, 1]} : vector<16x256xf32> to vector<4x256xf32>
    %c2 = arith.constant 2 : index
    %c0_39 = arith.constant 0 : index
    %c17_40 = arith.constant 17 : index
    %62 = vector.load %arg11[%c2, %c0_39, %c17_40] : memref<4x4x290xf32, #tpu.memory_space<vmem>>, vector<1x4x256xf32>
    %63 = vector.shape_cast %62 : vector<1x4x256xf32> to vector<4x256xf32>
    %64 = vector.shape_cast %61 : vector<4x256xf32> to vector<1x4x256xf32>
    tpu.vector_store %arg11[%c2, %c0_39, %c17_40], %64 {strides = array<i32>} : memref<4x4x290xf32, #tpu.memory_space<vmem>>, vector<1x4x256xf32>,
    %65 = vector.extract_strided_slice %50 {offsets = [12, 0], sizes = [4, 256], strides = [1, 1]} : vector<16x256xf32> to vector<4x256xf32>
    %c3 = arith.constant 3 : index
    %c0_41 = arith.constant 0 : index
    %c17_42 = arith.constant 17 : index
    %66 = vector.load %arg11[%c3, %c0_41, %c17_42] : memref<4x4x290xf32, #tpu.memory_space<vmem>>, vector<1x4x256xf32>
    %67 = vector.shape_cast %66 : vector<1x4x256xf32> to vector<4x256xf32>
    %68 = vector.shape_cast %65 : vector<4x256xf32> to vector<1x4x256xf32>
    tpu.vector_store %arg11[%c3, %c0_41, %c17_42], %68 {strides = array<i32>} : memref<4x4x290xf32, #tpu.memory_space<vmem>>, vector<1x4x256xf32>,
    %c3_43 = arith.constant 3 : index
    %c0_44 = arith.constant 0 : index
    %c0_45 = arith.constant 0 : index
    %69 = vector.load %arg11[%c3_43, %c0_44, %c0_45] : memref<4x4x290xf32, #tpu.memory_space<vmem>>, vector<1x4x290xf32>
    %70 = vector.shape_cast %69 : vector<1x4x290xf32> to vector<4x290xf32>
    %71 = vector.extract_strided_slice %70 {offsets = [0, 0], sizes = [4, 256], strides = [1, 1]} : vector<4x290xf32> to vector<4x256xf32>
    %72 = vector.broadcast %0 : vector<1x256xf32> to vector<4x256xf32>
    %73 = arith.mulf %71, %72 : vector<4x256xf32>
    %c0_46 = arith.constant 0 : index
    %c0_47 = arith.constant 0 : index
    %74 = vector.load %arg13[%c0_46, %c0_47] : memref<36x1024xf32, #tpu.memory_space<vmem>>, vector<4x256xf32>
    tpu.vector_store %arg13[%c0_46, %c0_47], %73 {strides = array<i32>} : memref<36x1024xf32, #tpu.memory_space<vmem>>, vector<4x256xf32>,
    %c2_48 = arith.constant 2 : index
    %c0_49 = arith.constant 0 : index
    %c0_50 = arith.constant 0 : index
    %75 = vector.load %arg11[%c2_48, %c0_49, %c0_50] : memref<4x4x290xf32, #tpu.memory_space<vmem>>, vector<1x4x290xf32>
    %76 = vector.shape_cast %75 : vector<1x4x290xf32> to vector<4x290xf32>
    %77 = vector.extract_strided_slice %76 {offsets = [0, 1], sizes = [4, 256], strides = [1, 1]} : vector<4x290xf32> to vector<4x256xf32>
    %c4_51 = arith.constant 4 : index
    %c0_52 = arith.constant 0 : index
    %78 = vector.load %arg13[%c4_51, %c0_52] : memref<36x1024xf32, #tpu.memory_space<vmem>>, vector<4x256xf32>
    tpu.vector_store %arg13[%c4_51, %c0_52], %77 {strides = array<i32>} : memref<36x1024xf32, #tpu.memory_space<vmem>>, vector<4x256xf32>,
    %c3_53 = arith.constant 3 : index
    %c0_54 = arith.constant 0 : index
    %c0_55 = arith.constant 0 : index
    %79 = vector.load %arg11[%c3_53, %c0_54, %c0_55] : memref<4x4x290xf32, #tpu.memory_space<vmem>>, vector<1x4x290xf32>
    %80 = vector.shape_cast %79 : vector<1x4x290xf32> to vector<4x290xf32>
    %81 = vector.extract_strided_slice %80 {offsets = [0, 1], sizes = [4, 256], strides = [1, 1]} : vector<4x290xf32> to vector<4x256xf32>
    %c8_56 = arith.constant 8 : index
    %c0_57 = arith.constant 0 : index
    %82 = vector.load %arg13[%c8_56, %c0_57] : memref<36x1024xf32, #tpu.memory_space<vmem>>, vector<4x256xf32>
    tpu.vector_store %arg13[%c8_56, %c0_57], %81 {strides = array<i32>} : memref<36x1024xf32, #tpu.memory_space<vmem>>, vector<4x256xf32>,
    %c1_58 = arith.constant 1 : index
    %c0_59 = arith.constant 0 : index
    %c0_60 = arith.constant 0 : index
    %83 = vector.load %arg11[%c1_58, %c0_59, %c0_60] : memref<4x4x290xf32, #tpu.memory_space<vmem>>, vector<1x4x290xf32>
    %84 = vector.shape_cast %83 : vector<1x4x290xf32> to vector<4x290xf32>
    %85 = vector.extract_strided_slice %84 {offsets = [0, 16], sizes = [4, 256], strides = [1, 1]} : vector<4x290xf32> to vector<4x256xf32>
    %86 = vector.broadcast %0 : vector<1x256xf32> to vector<4x256xf32>
    %87 = arith.mulf %85, %86 : vector<4x256xf32>
    %c12_61 = arith.constant 12 : index
    %c0_62 = arith.constant 0 : index
    %88 = vector.load %arg13[%c12_61, %c0_62] : memref<36x1024xf32, #tpu.memory_space<vmem>>, vector<4x256xf32>
    tpu.vector_store %arg13[%c12_61, %c0_62], %87 {strides = array<i32>} : memref<36x1024xf32, #tpu.memory_space<vmem>>, vector<4x256xf32>,
    %c0_63 = arith.constant 0 : index
    %c0_64 = arith.constant 0 : index
    %c0_65 = arith.constant 0 : index
    %89 = vector.load %arg11[%c0_63, %c0_64, %c0_65] : memref<4x4x290xf32, #tpu.memory_space<vmem>>, vector<1x4x290xf32>
    %90 = vector.shape_cast %89 : vector<1x4x290xf32> to vector<4x290xf32>
    %91 = vector.extract_strided_slice %90 {offsets = [0, 17], sizes = [4, 256], strides = [1, 1]} : vector<4x290xf32> to vector<4x256xf32>
    %c16_66 = arith.constant 16 : index
    %c0_67 = arith.constant 0 : index
    %92 = vector.load %arg13[%c16_66, %c0_67] : memref<36x1024xf32, #tpu.memory_space<vmem>>, vector<4x256xf32>
    tpu.vector_store %arg13[%c16_66, %c0_67], %91 {strides = array<i32>} : memref<36x1024xf32, #tpu.memory_space<vmem>>, vector<4x256xf32>,
    %c1_68 = arith.constant 1 : index
    %c0_69 = arith.constant 0 : index
    %c0_70 = arith.constant 0 : index
    %93 = vector.load %arg11[%c1_68, %c0_69, %c0_70] : memref<4x4x290xf32, #tpu.memory_space<vmem>>, vector<1x4x290xf32>
    %94 = vector.shape_cast %93 : vector<1x4x290xf32> to vector<4x290xf32>
    %95 = vector.extract_strided_slice %94 {offsets = [0, 17], sizes = [4, 256], strides = [1, 1]} : vector<4x290xf32> to vector<4x256xf32>
    %c20_71 = arith.constant 20 : index
    %c0_72 = arith.constant 0 : index
    %96 = vector.load %arg13[%c20_71, %c0_72] : memref<36x1024xf32, #tpu.memory_space<vmem>>, vector<4x256xf32>
    tpu.vector_store %arg13[%c20_71, %c0_72], %95 {strides = array<i32>} : memref<36x1024xf32, #tpu.memory_space<vmem>>, vector<4x256xf32>,
    %c3_73 = arith.constant 3 : index
    %c0_74 = arith.constant 0 : index
    %c0_75 = arith.constant 0 : index
    %97 = vector.load %arg11[%c3_73, %c0_74, %c0_75] : memref<4x4x290xf32, #tpu.memory_space<vmem>>, vector<1x4x290xf32>
    %98 = vector.shape_cast %97 : vector<1x4x290xf32> to vector<4x290xf32>
    %99 = vector.extract_strided_slice %98 {offsets = [0, 16], sizes = [4, 256], strides = [1, 1]} : vector<4x290xf32> to vector<4x256xf32>
    %100 = vector.broadcast %0 : vector<1x256xf32> to vector<4x256xf32>
    %101 = arith.mulf %99, %100 : vector<4x256xf32>
    %c24_76 = arith.constant 24 : index
    %c0_77 = arith.constant 0 : index
    %102 = vector.load %arg13[%c24_76, %c0_77] : memref<36x1024xf32, #tpu.memory_space<vmem>>, vector<4x256xf32>
    tpu.vector_store %arg13[%c24_76, %c0_77], %101 {strides = array<i32>} : memref<36x1024xf32, #tpu.memory_space<vmem>>, vector<4x256xf32>,
    %c2_78 = arith.constant 2 : index
    %c0_79 = arith.constant 0 : index
    %c0_80 = arith.constant 0 : index
    %103 = vector.load %arg11[%c2_78, %c0_79, %c0_80] : memref<4x4x290xf32, #tpu.memory_space<vmem>>, vector<1x4x290xf32>
    %104 = vector.shape_cast %103 : vector<1x4x290xf32> to vector<4x290xf32>
    %105 = vector.extract_strided_slice %104 {offsets = [0, 17], sizes = [4, 256], strides = [1, 1]} : vector<4x290xf32> to vector<4x256xf32>
    %c28_81 = arith.constant 28 : index
    %c0_82 = arith.constant 0 : index
    %106 = vector.load %arg13[%c28_81, %c0_82] : memref<36x1024xf32, #tpu.memory_space<vmem>>, vector<4x256xf32>
    tpu.vector_store %arg13[%c28_81, %c0_82], %105 {strides = array<i32>} : memref<36x1024xf32, #tpu.memory_space<vmem>>, vector<4x256xf32>,
    %c3_83 = arith.constant 3 : index
    %c0_84 = arith.constant 0 : index
    %c0_85 = arith.constant 0 : index
    %107 = vector.load %arg11[%c3_83, %c0_84, %c0_85] : memref<4x4x290xf32, #tpu.memory_space<vmem>>, vector<1x4x290xf32>
    %108 = vector.shape_cast %107 : vector<1x4x290xf32> to vector<4x290xf32>
    %109 = vector.extract_strided_slice %108 {offsets = [0, 17], sizes = [4, 256], strides = [1, 1]} : vector<4x290xf32> to vector<4x256xf32>
    %c32_86 = arith.constant 32 : index
    %c0_87 = arith.constant 0 : index
    %110 = vector.load %arg13[%c32_86, %c0_87] : memref<36x1024xf32, #tpu.memory_space<vmem>>, vector<4x256xf32>
    tpu.vector_store %arg13[%c32_86, %c0_87], %109 {strides = array<i32>} : memref<36x1024xf32, #tpu.memory_space<vmem>>, vector<4x256xf32>,
    %c0_88 = arith.constant 0 : index
    %c256 = arith.constant 256 : index
    %111 = vector.load %arg13[%c0_88, %c256] : memref<36x1024xf32, #tpu.memory_space<vmem>>, vector<4x256xf32>
    tpu.vector_store %arg13[%c0_88, %c256], %77 {strides = array<i32>} : memref<36x1024xf32, #tpu.memory_space<vmem>>, vector<4x256xf32>,
    %c4_89 = arith.constant 4 : index
    %c256_90 = arith.constant 256 : index
    %112 = vector.load %arg13[%c4_89, %c256_90] : memref<36x1024xf32, #tpu.memory_space<vmem>>, vector<4x256xf32>
    tpu.vector_store %arg13[%c4_89, %c256_90], %81 {strides = array<i32>} : memref<36x1024xf32, #tpu.memory_space<vmem>>, vector<4x256xf32>,
    %c2_91 = arith.constant 2 : index
    %c0_92 = arith.constant 0 : index
    %c0_93 = arith.constant 0 : index
    %113 = vector.load %arg11[%c2_91, %c0_92, %c0_93] : memref<4x4x290xf32, #tpu.memory_space<vmem>>, vector<1x4x290xf32>
    %114 = vector.shape_cast %113 : vector<1x4x290xf32> to vector<4x290xf32>
    %115 = vector.extract_strided_slice %114 {offsets = [0, 2], sizes = [4, 256], strides = [1, 1]} : vector<4x290xf32> to vector<4x256xf32>
    %116 = vector.broadcast %1 : vector<1x256xf32> to vector<4x256xf32>
    %117 = arith.mulf %115, %116 : vector<4x256xf32>
    %c8_94 = arith.constant 8 : index
    %c256_95 = arith.constant 256 : index
    %118 = vector.load %arg13[%c8_94, %c256_95] : memref<36x1024xf32, #tpu.memory_space<vmem>>, vector<4x256xf32>
    tpu.vector_store %arg13[%c8_94, %c256_95], %117 {strides = array<i32>} : memref<36x1024xf32, #tpu.memory_space<vmem>>, vector<4x256xf32>,
    %c12_96 = arith.constant 12 : index
    %c256_97 = arith.constant 256 : index
    %119 = vector.load %arg13[%c12_96, %c256_97] : memref<36x1024xf32, #tpu.memory_space<vmem>>, vector<4x256xf32>
    tpu.vector_store %arg13[%c12_96, %c256_97], %91 {strides = array<i32>} : memref<36x1024xf32, #tpu.memory_space<vmem>>, vector<4x256xf32>,
    %c16_98 = arith.constant 16 : index
    %c256_99 = arith.constant 256 : index
    %120 = vector.load %arg13[%c16_98, %c256_99] : memref<36x1024xf32, #tpu.memory_space<vmem>>, vector<4x256xf32>
    tpu.vector_store %arg13[%c16_98, %c256_99], %95 {strides = array<i32>} : memref<36x1024xf32, #tpu.memory_space<vmem>>, vector<4x256xf32>,
    %c0_100 = arith.constant 0 : index
    %c0_101 = arith.constant 0 : index
    %c0_102 = arith.constant 0 : index
    %121 = vector.load %arg11[%c0_100, %c0_101, %c0_102] : memref<4x4x290xf32, #tpu.memory_space<vmem>>, vector<1x4x290xf32>
    %122 = vector.shape_cast %121 : vector<1x4x290xf32> to vector<4x290xf32>
    %123 = vector.extract_strided_slice %122 {offsets = [0, 18], sizes = [4, 256], strides = [1, 1]} : vector<4x290xf32> to vector<4x256xf32>
    %124 = vector.broadcast %1 : vector<1x256xf32> to vector<4x256xf32>
    %125 = arith.mulf %123, %124 : vector<4x256xf32>
    %c20_103 = arith.constant 20 : index
    %c256_104 = arith.constant 256 : index
    %126 = vector.load %arg13[%c20_103, %c256_104] : memref<36x1024xf32, #tpu.memory_space<vmem>>, vector<4x256xf32>
    tpu.vector_store %arg13[%c20_103, %c256_104], %125 {strides = array<i32>} : memref<36x1024xf32, #tpu.memory_space<vmem>>, vector<4x256xf32>,
    %c24_105 = arith.constant 24 : index
    %c256_106 = arith.constant 256 : index
    %127 = vector.load %arg13[%c24_105, %c256_106] : memref<36x1024xf32, #tpu.memory_space<vmem>>, vector<4x256xf32>
    tpu.vector_store %arg13[%c24_105, %c256_106], %105 {strides = array<i32>} : memref<36x1024xf32, #tpu.memory_space<vmem>>, vector<4x256xf32>,
    %c28_107 = arith.constant 28 : index
    %c256_108 = arith.constant 256 : index
    %128 = vector.load %arg13[%c28_107, %c256_108] : memref<36x1024xf32, #tpu.memory_space<vmem>>, vector<4x256xf32>
    tpu.vector_store %arg13[%c28_107, %c256_108], %109 {strides = array<i32>} : memref<36x1024xf32, #tpu.memory_space<vmem>>, vector<4x256xf32>,
    %c2_109 = arith.constant 2 : index
    %c0_110 = arith.constant 0 : index
    %c0_111 = arith.constant 0 : index
    %129 = vector.load %arg11[%c2_109, %c0_110, %c0_111] : memref<4x4x290xf32, #tpu.memory_space<vmem>>, vector<1x4x290xf32>
    %130 = vector.shape_cast %129 : vector<1x4x290xf32> to vector<4x290xf32>
    %131 = vector.extract_strided_slice %130 {offsets = [0, 18], sizes = [4, 256], strides = [1, 1]} : vector<4x290xf32> to vector<4x256xf32>
    %132 = vector.broadcast %1 : vector<1x256xf32> to vector<4x256xf32>
    %133 = arith.mulf %131, %132 : vector<4x256xf32>
    %c32_112 = arith.constant 32 : index
    %c256_113 = arith.constant 256 : index
    %134 = vector.load %arg13[%c32_112, %c256_113] : memref<36x1024xf32, #tpu.memory_space<vmem>>, vector<4x256xf32>
    tpu.vector_store %arg13[%c32_112, %c256_113], %133 {strides = array<i32>} : memref<36x1024xf32, #tpu.memory_space<vmem>>, vector<4x256xf32>,
    %c0_114 = arith.constant 0 : index
    %c512 = arith.constant 512 : index
    %135 = vector.load %arg13[%c0_114, %c512] : memref<36x1024xf32, #tpu.memory_space<vmem>>, vector<4x256xf32>
    tpu.vector_store %arg13[%c0_114, %c512], %87 {strides = array<i32>} : memref<36x1024xf32, #tpu.memory_space<vmem>>, vector<4x256xf32>,
    %c4_115 = arith.constant 4 : index
    %c512_116 = arith.constant 512 : index
    %136 = vector.load %arg13[%c4_115, %c512_116] : memref<36x1024xf32, #tpu.memory_space<vmem>>, vector<4x256xf32>
    tpu.vector_store %arg13[%c4_115, %c512_116], %91 {strides = array<i32>} : memref<36x1024xf32, #tpu.memory_space<vmem>>, vector<4x256xf32>,
    %c8_117 = arith.constant 8 : index
    %c512_118 = arith.constant 512 : index
    %137 = vector.load %arg13[%c8_117, %c512_118] : memref<36x1024xf32, #tpu.memory_space<vmem>>, vector<4x256xf32>
    tpu.vector_store %arg13[%c8_117, %c512_118], %95 {strides = array<i32>} : memref<36x1024xf32, #tpu.memory_space<vmem>>, vector<4x256xf32>,
    %c12_119 = arith.constant 12 : index
    %c512_120 = arith.constant 512 : index
    %138 = vector.load %arg13[%c12_119, %c512_120] : memref<36x1024xf32, #tpu.memory_space<vmem>>, vector<4x256xf32>
    tpu.vector_store %arg13[%c12_119, %c512_120], %101 {strides = array<i32>} : memref<36x1024xf32, #tpu.memory_space<vmem>>, vector<4x256xf32>,
    %c16_121 = arith.constant 16 : index
    %c512_122 = arith.constant 512 : index
    %139 = vector.load %arg13[%c16_121, %c512_122] : memref<36x1024xf32, #tpu.memory_space<vmem>>, vector<4x256xf32>
    tpu.vector_store %arg13[%c16_121, %c512_122], %105 {strides = array<i32>} : memref<36x1024xf32, #tpu.memory_space<vmem>>, vector<4x256xf32>,
    %c20_123 = arith.constant 20 : index
    %c512_124 = arith.constant 512 : index
    %140 = vector.load %arg13[%c20_123, %c512_124] : memref<36x1024xf32, #tpu.memory_space<vmem>>, vector<4x256xf32>
    tpu.vector_store %arg13[%c20_123, %c512_124], %109 {strides = array<i32>} : memref<36x1024xf32, #tpu.memory_space<vmem>>, vector<4x256xf32>,
    %c1_125 = arith.constant 1 : index
    %c0_126 = arith.constant 0 : index
    %c0_127 = arith.constant 0 : index
    %141 = vector.load %arg11[%c1_125, %c0_126, %c0_127] : memref<4x4x290xf32, #tpu.memory_space<vmem>>, vector<1x4x290xf32>
    %142 = vector.shape_cast %141 : vector<1x4x290xf32> to vector<4x290xf32>
    %143 = vector.extract_strided_slice %142 {offsets = [0, 32], sizes = [4, 256], strides = [1, 1]} : vector<4x290xf32> to vector<4x256xf32>
    %144 = vector.broadcast %0 : vector<1x256xf32> to vector<4x256xf32>
    %145 = arith.mulf %143, %144 : vector<4x256xf32>
    %c24_128 = arith.constant 24 : index
    %c512_129 = arith.constant 512 : index
    %146 = vector.load %arg13[%c24_128, %c512_129] : memref<36x1024xf32, #tpu.memory_space<vmem>>, vector<4x256xf32>
    tpu.vector_store %arg13[%c24_128, %c512_129], %145 {strides = array<i32>} : memref<36x1024xf32, #tpu.memory_space<vmem>>, vector<4x256xf32>,
    %c0_130 = arith.constant 0 : index
    %c0_131 = arith.constant 0 : index
    %c0_132 = arith.constant 0 : index
    %147 = vector.load %arg11[%c0_130, %c0_131, %c0_132] : memref<4x4x290xf32, #tpu.memory_space<vmem>>, vector<1x4x290xf32>
    %148 = vector.shape_cast %147 : vector<1x4x290xf32> to vector<4x290xf32>
    %149 = vector.extract_strided_slice %148 {offsets = [0, 33], sizes = [4, 256], strides = [1, 1]} : vector<4x290xf32> to vector<4x256xf32>
    %c28_133 = arith.constant 28 : index
    %c512_134 = arith.constant 512 : index
    %150 = vector.load %arg13[%c28_133, %c512_134] : memref<36x1024xf32, #tpu.memory_space<vmem>>, vector<4x256xf32>
    tpu.vector_store %arg13[%c28_133, %c512_134], %149 {strides = array<i32>} : memref<36x1024xf32, #tpu.memory_space<vmem>>, vector<4x256xf32>,
    %c1_135 = arith.constant 1 : index
    %c0_136 = arith.constant 0 : index
    %c0_137 = arith.constant 0 : index
    %151 = vector.load %arg11[%c1_135, %c0_136, %c0_137] : memref<4x4x290xf32, #tpu.memory_space<vmem>>, vector<1x4x290xf32>
    %152 = vector.shape_cast %151 : vector<1x4x290xf32> to vector<4x290xf32>
    %153 = vector.extract_strided_slice %152 {offsets = [0, 33], sizes = [4, 256], strides = [1, 1]} : vector<4x290xf32> to vector<4x256xf32>
    %c32_138 = arith.constant 32 : index
    %c512_139 = arith.constant 512 : index
    %154 = vector.load %arg13[%c32_138, %c512_139] : memref<36x1024xf32, #tpu.memory_space<vmem>>, vector<4x256xf32>
    tpu.vector_store %arg13[%c32_138, %c512_139], %153 {strides = array<i32>} : memref<36x1024xf32, #tpu.memory_space<vmem>>, vector<4x256xf32>,
    %c0_140 = arith.constant 0 : index
    %c768 = arith.constant 768 : index
    %155 = vector.load %arg13[%c0_140, %c768] : memref<36x1024xf32, #tpu.memory_space<vmem>>, vector<4x256xf32>
    tpu.vector_store %arg13[%c0_140, %c768], %91 {strides = array<i32>} : memref<36x1024xf32, #tpu.memory_space<vmem>>, vector<4x256xf32>,
    %c4_141 = arith.constant 4 : index
    %c768_142 = arith.constant 768 : index
    %156 = vector.load %arg13[%c4_141, %c768_142] : memref<36x1024xf32, #tpu.memory_space<vmem>>, vector<4x256xf32>
    tpu.vector_store %arg13[%c4_141, %c768_142], %95 {strides = array<i32>} : memref<36x1024xf32, #tpu.memory_space<vmem>>, vector<4x256xf32>,
    %c8_143 = arith.constant 8 : index
    %c768_144 = arith.constant 768 : index
    %157 = vector.load %arg13[%c8_143, %c768_144] : memref<36x1024xf32, #tpu.memory_space<vmem>>, vector<4x256xf32>
    tpu.vector_store %arg13[%c8_143, %c768_144], %125 {strides = array<i32>} : memref<36x1024xf32, #tpu.memory_space<vmem>>, vector<4x256xf32>,
    %c12_145 = arith.constant 12 : index
    %c768_146 = arith.constant 768 : index
    %158 = vector.load %arg13[%c12_145, %c768_146] : memref<36x1024xf32, #tpu.memory_space<vmem>>, vector<4x256xf32>
    tpu.vector_store %arg13[%c12_145, %c768_146], %105 {strides = array<i32>} : memref<36x1024xf32, #tpu.memory_space<vmem>>, vector<4x256xf32>,
    %c16_147 = arith.constant 16 : index
    %c768_148 = arith.constant 768 : index
    %159 = vector.load %arg13[%c16_147, %c768_148] : memref<36x1024xf32, #tpu.memory_space<vmem>>, vector<4x256xf32>
    tpu.vector_store %arg13[%c16_147, %c768_148], %109 {strides = array<i32>} : memref<36x1024xf32, #tpu.memory_space<vmem>>, vector<4x256xf32>,
    %c20_149 = arith.constant 20 : index
    %c768_150 = arith.constant 768 : index
    %160 = vector.load %arg13[%c20_149, %c768_150] : memref<36x1024xf32, #tpu.memory_space<vmem>>, vector<4x256xf32>
    tpu.vector_store %arg13[%c20_149, %c768_150], %133 {strides = array<i32>} : memref<36x1024xf32, #tpu.memory_space<vmem>>, vector<4x256xf32>,
    %c24_151 = arith.constant 24 : index
    %c768_152 = arith.constant 768 : index
    %161 = vector.load %arg13[%c24_151, %c768_152] : memref<36x1024xf32, #tpu.memory_space<vmem>>, vector<4x256xf32>
    tpu.vector_store %arg13[%c24_151, %c768_152], %149 {strides = array<i32>} : memref<36x1024xf32, #tpu.memory_space<vmem>>, vector<4x256xf32>,
    %c28_153 = arith.constant 28 : index
    %c768_154 = arith.constant 768 : index
    %162 = vector.load %arg13[%c28_153, %c768_154] : memref<36x1024xf32, #tpu.memory_space<vmem>>, vector<4x256xf32>
    tpu.vector_store %arg13[%c28_153, %c768_154], %153 {strides = array<i32>} : memref<36x1024xf32, #tpu.memory_space<vmem>>, vector<4x256xf32>,
    %c0_155 = arith.constant 0 : index
    %c0_156 = arith.constant 0 : index
    %c0_157 = arith.constant 0 : index
    %163 = vector.load %arg11[%c0_155, %c0_156, %c0_157] : memref<4x4x290xf32, #tpu.memory_space<vmem>>, vector<1x4x290xf32>
    %164 = vector.shape_cast %163 : vector<1x4x290xf32> to vector<4x290xf32>
    %165 = vector.extract_strided_slice %164 {offsets = [0, 34], sizes = [4, 256], strides = [1, 1]} : vector<4x290xf32> to vector<4x256xf32>
    %166 = vector.broadcast %1 : vector<1x256xf32> to vector<4x256xf32>
    %167 = arith.mulf %165, %166 : vector<4x256xf32>
    %c32_158 = arith.constant 32 : index
    %c768_159 = arith.constant 768 : index
    %168 = vector.load %arg13[%c32_158, %c768_159] : memref<36x1024xf32, #tpu.memory_space<vmem>>, vector<4x256xf32>
    tpu.vector_store %arg13[%c32_158, %c768_159], %167 {strides = array<i32>} : memref<36x1024xf32, #tpu.memory_space<vmem>>, vector<4x256xf32>,
    %c0_160 = arith.constant 0 : index
    %c0_161 = arith.constant 0 : index
    %169 = vector.load %arg5[%c0_160, %c0_161] : memref<4x36xf32, #tpu.memory_space<vmem>>, vector<4x36xf32>
    %c0_162 = arith.constant 0 : index
    %c0_163 = arith.constant 0 : index
    %170 = vector.load %arg13[%c0_162, %c0_163] : memref<36x1024xf32, #tpu.memory_space<vmem>>, vector<36x1024xf32>
    %cst_164 = arith.constant dense<0.000000e+00> : vector<4x1024xf32>
    %171 = tpu.matmul %169, %170, %cst_164 {dimension_numbers = #tpu.dot_dimension_numbers<[1], [0], [0], [1], [0, 0, 1, 1], [], []>} : vector<4x36xf32>, vector<36x1024xf32>, vector<4x1024xf32> -> vector<4x1024xf32>
    %c0_165 = arith.constant 0 : index
    %c0_166 = arith.constant 0 : index
    %172 = vector.load %arg6[%c0_165, %c0_166] : memref<4x1xf32, #tpu.memory_space<vmem>>, vector<4x1xf32>
    %173 = vector.broadcast %172 : vector<4x1xf32> to vector<4x1024xf32>
    %174 = arith.addf %171, %173 : vector<4x1024xf32>
    %c0_167 = arith.constant 0 : index
    %c0_168 = arith.constant 0 : index
    %175 = vector.load %arg7[%c0_167, %c0_168] : memref<4x4xf32, #tpu.memory_space<vmem>>, vector<4x4xf32>
    %176 = arith.mulf %174, %174 : vector<4x1024xf32>
    %cst_169 = arith.constant dense<0.000000e+00> : vector<4x1024xf32>
    %177 = tpu.matmul %175, %176, %cst_169 {dimension_numbers = #tpu.dot_dimension_numbers<[1], [0], [0], [1], [0, 0, 1, 1], [], []>} : vector<4x4xf32>, vector<4x1024xf32>, vector<4x1024xf32> -> vector<4x1024xf32>
    %c0_170 = arith.constant 0 : index
    %c0_171 = arith.constant 0 : index
    %178 = vector.load %arg8[%c0_170, %c0_171] : memref<4x1xf32, #tpu.memory_space<vmem>>, vector<4x1xf32>
    %179 = vector.broadcast %178 : vector<4x1xf32> to vector<4x1024xf32>
    %180 = arith.addf %177, %179 : vector<4x1024xf32>
    %cst_172 = arith.constant 0.000000e+00 : f32
    %181 = vector.broadcast %cst_172 : f32 to vector<4x1024xf32>
    %182 = arith.maximumf %180, %181 : vector<4x1024xf32>
    %183 = math.sqrt %182 : vector<4x1024xf32>
    %184 = arith.mulf %174, %183 : vector<4x1024xf32>
    %185 = vector.extract_strided_slice %184 {offsets = [0, 0], sizes = [4, 256], strides = [1, 1]} : vector<4x1024xf32> to vector<4x256xf32>
    %186 = vector.extract_strided_slice %45 {offsets = [0, 0], sizes = [4, 256], strides = [1, 1]} : vector<16x256xf32> to vector<4x256xf32>
    %187 = arith.addf %185, %186 : vector<4x256xf32>
    %c0_173 = arith.constant 0 : index
    %c0_174 = arith.constant 0 : index
    %c0_175 = arith.constant 0 : index
    %188 = vector.load %arg9[%c0_173, %c0_174, %c0_175] : memref<1x16x256xf32, #tpu.memory_space<vmem>>, vector<1x4x256xf32>
    %189 = vector.shape_cast %188 : vector<1x4x256xf32> to vector<4x256xf32>
    %190 = vector.shape_cast %187 : vector<4x256xf32> to vector<1x4x256xf32>
    tpu.vector_store %arg9[%c0_173, %c0_174, %c0_175], %190 {strides = array<i32>} : memref<1x16x256xf32, #tpu.memory_space<vmem>>, vector<1x4x256xf32>,
    %191 = vector.extract_strided_slice %184 {offsets = [0, 256], sizes = [4, 256], strides = [1, 1]} : vector<4x1024xf32> to vector<4x256xf32>
    %192 = vector.extract_strided_slice %45 {offsets = [4, 0], sizes = [4, 256], strides = [1, 1]} : vector<16x256xf32> to vector<4x256xf32>
    %193 = arith.addf %191, %192 : vector<4x256xf32>
    %c0_176 = arith.constant 0 : index
    %c4_177 = arith.constant 4 : index
    %c0_178 = arith.constant 0 : index
    %194 = vector.load %arg9[%c0_176, %c4_177, %c0_178] : memref<1x16x256xf32, #tpu.memory_space<vmem>>, vector<1x4x256xf32>
    %195 = vector.shape_cast %194 : vector<1x4x256xf32> to vector<4x256xf32>
    %196 = vector.shape_cast %193 : vector<4x256xf32> to vector<1x4x256xf32>
    tpu.vector_store %arg9[%c0_176, %c4_177, %c0_178], %196 {strides = array<i32>} : memref<1x16x256xf32, #tpu.memory_space<vmem>>, vector<1x4x256xf32>,
    %197 = vector.extract_strided_slice %184 {offsets = [0, 512], sizes = [4, 256], strides = [1, 1]} : vector<4x1024xf32> to vector<4x256xf32>
    %198 = vector.extract_strided_slice %45 {offsets = [8, 0], sizes = [4, 256], strides = [1, 1]} : vector<16x256xf32> to vector<4x256xf32>
    %199 = arith.addf %197, %198 : vector<4x256xf32>
    %c0_179 = arith.constant 0 : index
    %c8_180 = arith.constant 8 : index
    %c0_181 = arith.constant 0 : index
    %200 = vector.load %arg9[%c0_179, %c8_180, %c0_181] : memref<1x16x256xf32, #tpu.memory_space<vmem>>, vector<1x4x256xf32>
    %201 = vector.shape_cast %200 : vector<1x4x256xf32> to vector<4x256xf32>
    %202 = vector.shape_cast %199 : vector<4x256xf32> to vector<1x4x256xf32>
    tpu.vector_store %arg9[%c0_179, %c8_180, %c0_181], %202 {strides = array<i32>} : memref<1x16x256xf32, #tpu.memory_space<vmem>>, vector<1x4x256xf32>,
    %203 = vector.extract_strided_slice %184 {offsets = [0, 768], sizes = [4, 256], strides = [1, 1]} : vector<4x1024xf32> to vector<4x256xf32>
    %204 = vector.extract_strided_slice %45 {offsets = [12, 0], sizes = [4, 256], strides = [1, 1]} : vector<16x256xf32> to vector<4x256xf32>
    %205 = arith.addf %203, %204 : vector<4x256xf32>
    %c0_182 = arith.constant 0 : index
    %c12_183 = arith.constant 12 : index
    %c0_184 = arith.constant 0 : index
    %206 = vector.load %arg9[%c0_182, %c12_183, %c0_184] : memref<1x16x256xf32, #tpu.memory_space<vmem>>, vector<1x4x256xf32>
    %207 = vector.shape_cast %206 : vector<1x4x256xf32> to vector<4x256xf32>
    %208 = vector.shape_cast %205 : vector<4x256xf32> to vector<1x4x256xf32>
    tpu.vector_store %arg9[%c0_182, %c12_183, %c0_184], %208 {strides = array<i32>} : memref<1x16x256xf32, #tpu.memory_space<vmem>>, vector<1x4x256xf32>,
    return
  }
  func.func @transform_0(%arg0: i32) -> (i32, i32, i32) {
    %c0_i32 = arith.constant 0 : i32
    %c0_i32_0 = arith.constant 0 : i32
    %c0_i32_1 = arith.constant 0 : i32
    return %arg0, %c0_i32, %c0_i32_0 : i32, i32, i32
  }
  func.func @transform_1(%arg0: i32) -> (i32, i32) {
    %c0_i32 = arith.constant 0 : i32
    %c0_i32_0 = arith.constant 0 : i32
    %c0_i32_1 = arith.constant 0 : i32
    return %c0_i32, %c0_i32_0 : i32, i32
  }
  func.func @transform_2(%arg0: i32) -> (i32, i32) {
    %c0_i32 = arith.constant 0 : i32
    %c0_i32_0 = arith.constant 0 : i32
    %c0_i32_1 = arith.constant 0 : i32
    return %c0_i32, %c0_i32_0 : i32, i32
  }
  func.func @transform_3(%arg0: i32) -> (i32, i32) {
    %c0_i32 = arith.constant 0 : i32
    %c0_i32_0 = arith.constant 0 : i32
    %c0_i32_1 = arith.constant 0 : i32
    return %c0_i32, %c0_i32_0 : i32, i32
  }
  func.func @transform_4(%arg0: i32) -> (i32, i32) {
    %c0_i32 = arith.constant 0 : i32
    %c0_i32_0 = arith.constant 0 : i32
    %c0_i32_1 = arith.constant 0 : i32
    return %c0_i32, %c0_i32_0 : i32, i32
  }
  func.func @transform_5(%arg0: i32) -> (i32, i32) {
    %c0_i32 = arith.constant 0 : i32
    %c0_i32_0 = arith.constant 0 : i32
    %c0_i32_1 = arith.constant 0 : i32
    return %c0_i32, %c0_i32_0 : i32, i32
  }
  func.func @transform_6(%arg0: i32) -> (i32, i32) {
    %c0_i32 = arith.constant 0 : i32
    %c0_i32_0 = arith.constant 0 : i32
    %c0_i32_1 = arith.constant 0 : i32
    return %c0_i32, %c0_i32_0 : i32, i32
  }
  func.func @transform_7(%arg0: i32) -> (i32, i32) {
    %c0_i32 = arith.constant 0 : i32
    %c0_i32_0 = arith.constant 0 : i32
    %c0_i32_1 = arith.constant 0 : i32
    return %c0_i32, %c0_i32_0 : i32, i32
  }
  func.func @transform_8(%arg0: i32) -> (i32, i32, i32) {
    %c0_i32 = arith.constant 0 : i32
    %c0_i32_0 = arith.constant 0 : i32
    %c0_i32_1 = arith.constant 0 : i32
    return %arg0, %c0_i32, %c0_i32_0 : i32, i32, i32
  }
}

</mosaic_0001>

<bundles_post_ra>
// kernel: residual_block_upsample.1
= control target key start
LH: loop header
LB: loop body
LE: loop exit
PB: predicated region body
PF: predicated region fallthrough
CT: control target
= control target key end

     0   :  { %s2197_s27 = smov 0   ;;  %s2765_s0 = inlined_call_operand.vmem [shape: f32[2,4,256], index: 0, kind: input, shape index: {}]   ;;  %s2766_s1 = inlined_call_operand.vmem [shape: f32[2,256], index: 1, kind: input, shape index: {}]   ;;  %s2767_s2 = inlined_call_operand.vmem [shape: f32[32,36], index: 2, kind: input, shape index: {}]   ;;  %s2768_s3 = inlined_call_operand.vmem [shape: f32[32,1], index: 3, kind: input, shape index: {}]   ;;  %s2769_s4 = inlined_call_operand.vmem [shape: f32[4,36], index: 4, kind: input, shape index: {}]   ;;  %s2770_s5 = inlined_call_operand.vmem [shape: f32[4,1], index: 5, kind: input, shape index: {}]   ;;  %s2771_s6 = inlined_call_operand.vmem [shape: f32[4,4], index: 6, kind: input, shape index: {}]   ;;  %s2772_s7 = inlined_call_operand.vmem [shape: f32[4,1], index: 7, kind: input, shape index: {}]   ;;  %s2773_s8 = inlined_call_operand.vmem [shape: f32[2,16,256], index: 8, kind: output, shape index: {}]  }
   0x1 LB: > { %s2025_s28 = sadd.s32 4294967295, %s2134_s27   ;;  %p2029_p0 = scmp.ge.s32.totalorder %s2134_s27, 1  ;;  %s2134_s27 = sphi %s2197_s27, %s18_s27  }
   0x2   : > { %p262_p1 = scmp.lt.s32.totalorder %s2134_s27, 3 }
   0x4   : > { %p263_p2 = pnand %p2029_p0, %p262_p1 }
   0x5   : > { %p296_p3 = scmp.lt.s32.totalorder (!%p263_p2), %s2025_s28, 1  ;;  %s2137_s15 = smov (!%p263_p2), 17  }
   0x6   : > { %266 = sbr.rel (%p263_p2) target bundleno = 1323 (0x52b), region = 52  ;;  %s2138_s16 = smov (!%p263_p2), 32  }
   0x7   : > { %s2139_s17 = smov (!%p263_p2), 34   ;;  %s2140_s18 = smov (!%p263_p2), 18  }
   0x8   : > { %s2141_s19 = smov (!%p263_p2), 2   ;;  %s2142_s20 = smov (!%p263_p2), 16  }
   0x9   : > { %s2143_s21 = smov (!%p263_p2), 111   ;;  %s2144_s22 = smov (!%p263_p2), 95  }
   0xa   : > { %s2145_s23 = smov (!%p263_p2), 96   ;;  %s2146_s24 = smov (!%p263_p2), 127  }
   0xb   : > { %v330_v0 = vlaneseq  ;;  %v2136_v1 = vmov 0.0   ;;  %vm310_vm0 = vcmask 273408   ;;  %s2780_s28 = smov (!%p296_p3, %s2025_s28), 1  ;;  %v306_v3 = vld [vmem:[%s2766_s1] ss:$2 sm:$0x3] }
   0xc   : > { %309 = vst [vmem:[#allocation2] sm:$0xff] %v2136_v1  ;;  %686 = vst [vmem:[#allocation3] sm:$0xff] %v2136_v1  ;;  %649 = vmatprep.mubr.f32.mxu0 %v2136_v1  ;;  %1311 = vmatprep.mubr.f32.mxu1 %v2136_v1  ;;  %v2034_v4 = vld [vmem:[%s2766_s1 + $0x1] ss:$2 sm:$0x3]  ;;  %s2067_s11 = sshll.u32 %s2780_s28, 3 }
   0xd   : > { %688 = vst [vmem:[#allocation3 + $0xc] sm:$0xff] %v2136_v1  ;;  %690 = vst [vmem:[#allocation3 + $0x18] sm:$0xff] %v2136_v1  ;;  %v331_v2 = vshrl.u32 %v330_v0, 7  ;;  %s300_s14 = scalar_lea.vmem %s2765_s0, %s2067_s11  ;;  %vm321_vm1 = vcmask 1043592   ;;  %vm322_vm2 = vcmask 1047556   ;;  %vm317_vm3 = vcmask 138240  }
   0xe   : > { %692 = vst [vmem:[#allocation3 + $0x24] sm:$0xff] %v2136_v1  ;;  %311 = vst.msk [vmem:[#allocation2 + $0x8] sm:$0xf] %vm310_vm0, %v2136_v1  ;;  %v312_v7 = vld [vmem:[%s300_s14] sm:$0xff]  ;;  %vm325_vm4 = vcmask 134144   ;;  %vm505_vm6 = vcmask 277504  }
   0xf   : > { %687 = vst.msk [vmem:[#allocation3 + $0x8] sm:$0xf] %vm310_vm0, %v2136_v1  ;;  %689 = vst.msk [vmem:[#allocation3 + $0x14] sm:$0xf] %vm310_vm0, %v2136_v1  ;;  %v332_v5 = vsub.s32 0, %v331_v2  ;;  %v336_v6 = vsub.s32 1, %v331_v2  ;;  %314 = vrot.lane.b32.xlu0 %v312_v7, %s2137_s15 }
  0x10   : > { %691 = vst.msk [vmem:[#allocation3 + $0x20] sm:$0xf] %vm310_vm0, %v2136_v1  ;;  %693 = vst.msk [vmem:[#allocation3 + $0x2c] sm:$0xf] %vm310_vm0, %v2136_v1  ;;  %vm467_vm7 = vcmask 261120   ;;  %s2147_s25 = smov 126  }
  0x11   : > { %v333_v8 = vrot.slane %v306_v3, %v332_v5  ;;  %v337_v9 = vrot.slane %v306_v3, %v336_v6  ;;  %v367_v10 = vrot.slane %v2034_v4, %v332_v5  ;;  %v371_v11 = vrot.slane %v2034_v4, %v336_v6  ;;  %vm2234_vm5 = vmor %vm322_vm2, %vm321_vm1  ;;  %s2148_s26 = smov 94   ;;  %s2149_s29 = smov 110   ;;  %v541_v57 = vld [vmem:[%s2768_s3] sm:$0xff]  ;;  %v542_v58 = vld [vmem:[%s2768_s3 + $0x8] sm:$0xff] }
  0x12   : > { %vm441_vm8 = vcmask 146432   ;;  %vm401_vm9 = vcmask 130048   ;;  %vm376_vm10 = vcmask 15360   ;;  %s2150_s30 = smov 112   ;;  %v2151_v59 = vmov 0   ;;  %s2068_s13 = sshll.u32 %s2780_s28, 5 }
  0x13   : > { %v2230_v12 = vcombine.low %v333_v8, %v337_v9  ;;  %v372_v13 = vcombine.low %v367_v10, %v371_v11  ;;  %2094 = vset.pattern.permute.xlu1 %v2151_v59  ;;  %2093 = vset.pattern.permute.xlu0 %v2151_v59  ;;  %vm495_vm11 = vcmask 777216   ;;  %vm431_vm12 = vcmask 908288  }
  0x14   : > { %vm457_vm13 = vcmask 900096   ;;  %vm417_vm14 = vcmask 916480   ;;  %vm520_vm15 = vcmask 769024   ;;  %vm482_vm0 = vcmask 785408  }
  0x15   : > { %464 = vrot.lane.b32.xlu1 %v2230_v12, %s2138_s16  ;;  %502 = vrot.lane.b32.xlu0 %v372_v13, %s2139_s17  ;;  %vm2774_vm1 = vcmask 1031168   ;;  %vm578_vm2 = vcmask 1043456   ;;  %s2734_s17 = scalar_lea.vmem %s2773_s8, %s2068_s13 }
  0x19   : > { %438 = vrot.lane.b32.xlu1 %v372_v13, %s2140_s18  ;;  %373 = vrot.lane.b32.xlu0 %v372_v13, %s2141_s19 }
  0x1d   : > { %398 = vrot.lane.b32.xlu1 %v2230_v12, %s2142_s20 }
  0x81   : > { %v315_v14 = vpop.permute.xlu0 %314 }
  0x82   : > { %v316_v16 = vrot.slane %v315_v14, 4 }
  0x84   : > { %v318_v17 = vsel %vm317_vm3, %v316_v16, %v315_v14  ;;  %326 = vst.msk [vmem:[#allocation2 + $0x8] sm:$0xf] %vm325_vm4, %v316_v16 }
  0x85   : > { %324 = vst.msk [vmem:[#allocation2] sm:$0xff] %vm2234_vm5, %v318_v17 }
  0x87   : > { %v465_v18 = vpop.permute.xlu1 %464  ;;  %v503_v19 = vpop.permute.xlu0 %502 }
  0x88   : > { %v2242_v20 = vrot.slane %v465_v18, 4  ;;  %v2252_v28 = vrot.slane %v503_v19, 4 }
  0x8a   : > { %v2258_v32 = vsel %vm505_vm6, %v2252_v28, %v503_v19  ;;  %v2262_v34 = vsel %vm467_vm7, %v2242_v20, %v465_v18  ;;  %vm356_vm6 = vcmask 1039360   ;;  %vm565_vm7 = vcmask 293888  }
  0x8b   : > { %v328_v21 = vld [vmem:[#allocation2 + $0x8] sm:$0xf]  ;;  %v374_v24 = vpop.permute.xlu0 %373  ;;  %v439_v30 = vpop.permute.xlu1 %438 }
  0x8c   : > { %429 = vrot.lane.b32.xlu0 %v328_v21, %s2143_s21  ;;  %v327_v22 = vld [vmem:[#allocation2] sm:$0xff]  ;;  %v472_v23 = vmul.f32 %v2242_v20, %v328_v21  ;;  %v2250_v26 = vrot.slane %v374_v24, 4  ;;  %v349_v27 = vcombine.low %v328_v21, %v328_v21  ;;  %v510_v33 = vmul.f32 %v2252_v28, %v328_v21 }
  0x8d   : > { %491 = vrot.lane.b32.xlu1 %v327_v22, %s2144_s22  ;;  %v340_v25 = vmul.f32 %v2230_v12, %v327_v22  ;;  %v2266_v35 = vrot.slane %v439_v30, 4  ;;  %v509_v36 = vmul.f32 %v2258_v32, %v327_v22  ;;  %v471_v38 = vmul.f32 %v2262_v34, %v327_v22 }
  0x8e   : > { %v381_v31 = vmul.f32 %v2250_v26, %v328_v21  ;;  %v348_v40 = vcombine.low %v327_v22, %v327_v22  ;;  %v424_v42 = vcombine.high %v327_v22, %v327_v22  ;;  %v2289_v50 = vsel %vm376_vm10, %v2250_v26, %v374_v24 }
  0x8f   : > { %v342_v29 = vcombine.high %v340_v25, %v340_v25  ;;  %344 = vst [vmem:[#allocation4 + $0x30] sm:$0xf] %v340_v25  ;;  %v399_v37 = vpop.permute.xlu1 %398  ;;  %v446_v41 = vmul.f32 %v2266_v35, %v328_v21  ;;  %v2276_v43 = vsel %vm441_vm8, %v2266_v35, %v439_v30  ;;  %v513_v51 = vcombine.high %v509_v36, %v509_v36 }
  0x90   : > { %480 = vrot.lane.b32.xlu0 %v472_v23, %s2145_s23  ;;  %v2272_v39 = vrot.slane %v399_v37, 4  ;;  %v445_v46 = vmul.f32 %v2276_v43, %v327_v22  ;;  %v380_v52 = vmul.f32 %v2289_v50, %v327_v22  ;;  %v475_v54 = vcombine.high %v471_v38, %v471_v38 }
  0x91   : > { %425 = vrot.lane.b32.xlu1 %v327_v22, %s2143_s21  ;;  %345 = vst [vmem:[#allocation4] sm:$0xf] %v342_v29  ;;  %v450_v44 = vcombine.low %v446_v41, %v446_v41 }
  0x92   : > { %v406_v45 = vmul.f32 %v2272_v39, %v328_v21  ;;  %v2283_v47 = vsel %vm401_vm9, %v2272_v39, %v399_v37  ;;  %v449_v53 = vcombine.low %v445_v46, %v445_v46  ;;  %v384_v56 = vcombine.high %v380_v52, %v380_v52 }
  0x93   : > { %v405_v49 = vmul.f32 %v2283_v47, %v327_v22 }
  0x94   : > { %493 = vrot.lane.b32.xlu0 %v349_v27, %s2144_s22  ;;  %v410_v48 = vcombine.low %v406_v45, %v406_v45 }
  0x95   : > { %352 = vrot.lane.b32.xlu1 %v327_v22, %s2146_s24  ;;  %v409_v55 = vcombine.low %v405_v49, %v405_v49 }
  0x98   : > { %389 = vrot.lane.b32.xlu0 %v381_v31, %s2147_s25 }
  0x99   : > { %518 = vrot.lane.b32.xlu1 %v510_v33, %s2148_s26 }
  0x9c   : > { %514 = vrot.lane.b32.xlu0 %v509_v36, %s2148_s26 }
  0x9d   : > { %476 = vrot.lane.b32.xlu1 %v471_v38, %s2145_s23 }
  0xa0   : > { %489 = vrot.lane.b32.xlu0 %v348_v40, %s2144_s22 }
  0xa1   : > { %427 = vrot.lane.b32.xlu1 %v424_v42, %s2143_s21 }
  0xa4   : > { %455 = vrot.lane.b32.xlu0 %v450_v44, %s2149_s29 }
  0xa5   : > { %453 = vrot.lane.b32.xlu1 %v445_v46, %s2149_s29 }
  0xa8   : > { %415 = vrot.lane.b32.xlu0 %v410_v48, %s2150_s30 }
  0xa9   : > { %413 = vrot.lane.b32.xlu1 %v405_v49, %s2150_s30 }
  0xac   : > { %516 = vrot.lane.b32.xlu0 %v513_v51, %s2148_s26 }
  0xad   : > { %385 = vrot.lane.b32.xlu1 %v380_v52, %s2147_s25 }
  0xb0   : > { %451 = vrot.lane.b32.xlu0 %v449_v53, %s2149_s29 }
  0xb1   : > { %478 = vrot.lane.b32.xlu1 %v475_v54, %s2145_s23 }
  0xb4   : > { %411 = vrot.lane.b32.xlu0 %v409_v55, %s2150_s30 }
  0xb5   : > { %387 = vrot.lane.b32.xlu1 %v384_v56, %s2147_s25 }
  0xb8   : > { %354 = vrot.lane.b32.xlu0 %v349_v27, %s2146_s24 }
  0xb9   : > { %350 = vrot.lane.b32.xlu1 %v348_v40, %s2146_s24 }
  0xbc   : > { %552 = vperm.xlu0 %2093, %v542_v58   ;;  %v527_v58 = vld [vmem:[%s2767_s2] sm:$0xff] }
  0xbd   : > { %547 = vperm.xlu1 %2094, %v541_v57  }
  0xfe   : > { %v430_v60 = vpop.permute.xlu0 %429 }
  0xff   : > { %v492_v61 = vpop.permute.xlu1 %491 }
 0x102   : > { %v481_v62 = vpop.permute.xlu0 %480 }
 0x103   : > { %v426_v63 = vpop.permute.xlu1 %425 }
 0x106   : > { %v494_v0 = vpop.permute.xlu0 %493 }
 0x107   : > { %v497_v2 = vsel %vm495_vm11, %v492_v61, %v494_v0  ;;  %v353_v3 = vpop.permute.xlu1 %352 }
 0x108   : > { %501 = vst [vmem:[#allocation4 + $0x20] sm:$0xf0] %v497_v2 }
 0x10a   : > { %v390_v4 = vpop.permute.xlu0 %389 }
 0x10b   : > { %v519_v5 = vpop.permute.xlu1 %518 }
 0x10e   : > { %v515_v6 = vpop.permute.xlu0 %514 }
 0x10f   : > { %v477_v7 = vpop.permute.xlu1 %476 }
 0x112   : > { %v490_v8 = vpop.permute.xlu0 %489 }
 0x113   : > { %v496_v9 = vsel %vm495_vm11, %v490_v8, %v492_v61  ;;  %v428_v10 = vpop.permute.xlu1 %427 }
 0x114   : > { %500 = vst [vmem:[#allocation4 + $0x8] sm:$0xf0] %v496_v9  ;;  %v432_v11 = vsel %vm431_vm12, %v426_v63, %v428_v10  ;;  %v433_v13 = vsel %vm431_vm12, %v428_v10, %v430_v60  ;;  %v528_v60 = vld [vmem:[%s2767_s2 + $0x8] sm:$0xff] }
 0x115   : > { %436 = vst [vmem:[#allocation4 + $0x48] sm:$0xf] %v432_v11  ;;  %437 = vst [vmem:[#allocation4 + $0x28] sm:$0xf] %v433_v13 }
 0x116   : > { %v456_v14 = vpop.permute.xlu0 %455 }
 0x117   : > { %v454_v16 = vpop.permute.xlu1 %453 }
 0x118   : > { %v459_v17 = vsel %vm457_vm13, %v454_v16, %v456_v14 }
 0x119   : > { %463 = vst [vmem:[#allocation4 + $0x28] sm:$0xf0] %v459_v17 }
 0x11a   : > { %v416_v18 = vpop.permute.xlu0 %415 }
 0x11b   : > { %v414_v19 = vpop.permute.xlu1 %413 }
 0x11c   : > { %v419_v21 = vsel %vm417_vm14, %v414_v19, %v416_v18 }
 0x11d   : > { %423 = vst [vmem:[#allocation4 + $0x10] sm:$0xf0] %v419_v21 }
 0x11e   : > { %v517_v22 = vpop.permute.xlu0 %516 }
 0x11f   : > { %v521_v23 = vsel %vm520_vm15, %v515_v6, %v517_v22  ;;  %v522_v24 = vsel %vm520_vm15, %v517_v22, %v519_v5  ;;  %v386_v25 = vpop.permute.xlu1 %385 }
 0x120   : > { %525 = vst [vmem:[#allocation4 + $0x40] sm:$0xf] %v521_v23  ;;  %526 = vst [vmem:[#allocation4 + $0x38] sm:$0xf] %v522_v24  ;;  %v536_v53 = vld [vmem:[#allocation4 + $0x28] sm:$0xff]  ;;  %v529_v23 = vld [vmem:[%s2767_s2 + $0x10] sm:$0xff] }
 0x121   : > { %v530_v24 = vld [vmem:[%s2767_s2 + $0x18] sm:$0xff] }
 0x122   : > { %v452_v27 = vpop.permute.xlu0 %451 }
 0x123   : > { %v458_v29 = vsel %vm457_vm13, %v452_v27, %v454_v16  ;;  %v479_v30 = vpop.permute.xlu1 %478 }
 0x124   : > { %462 = vst [vmem:[#allocation4 + $0x48] sm:$0xf0] %v458_v29  ;;  %v483_v31 = vsel %vm482_vm0, %v477_v7, %v479_v30  ;;  %v484_v33 = vsel %vm482_vm0, %v479_v30, %v481_v62 }
 0x125   : > { %487 = vst [vmem:[#allocation4 + $0x8] sm:$0xf] %v483_v31  ;;  %488 = vst [vmem:[#allocation4 + $0x20] sm:$0xf] %v484_v33 }
 0x126   : > { %v412_v36 = vpop.permute.xlu0 %411 }
 0x127   : > { %v418_v37 = vsel %vm417_vm14, %v412_v36, %v414_v19  ;;  %v388_v38 = vpop.permute.xlu1 %387  ;;  %v540_v40 = vld [vmem:[#allocation4 + $0x38] sm:$0xf]  ;;  %v539_v41 = vld [vmem:[#allocation4 + $0x40] sm:$0xf] }
 0x128   : > { %422 = vst [vmem:[#allocation4 + $0x18] sm:$0xf0] %v418_v37  ;;  %v392_v42 = vsel %vm2774_vm1, %v386_v25, %v388_v38  ;;  %v393_v44 = vsel %vm2774_vm1, %v388_v38, %v390_v4  ;;  %2035 = vmatprep.subr.msk.mxu0 %vm578_vm2, %v540_v40 }
 0x129   : > { %396 = vst [vmem:[#allocation4 + $0x18] sm:$0xf] %v392_v42  ;;  %397 = vst [vmem:[#allocation4 + $0x10] sm:$0xf] %v393_v44  ;;  %2036 = vmatpush1.msk.msra.mxu0 %vm578_vm2, %v539_v41 }
 0x12a   : > { %v355_v45 = vpop.permute.xlu0 %354 }
 0x12b   : > { %v358_v46 = vsel %vm356_vm6, %v353_v3, %v355_v45  ;;  %v351_v48 = vpop.permute.xlu1 %350  ;;  %v535_v54 = vld [vmem:[#allocation4 + $0x48] sm:$0xff] }
 0x12c   : > { %362 = vst [vmem:[#allocation4] sm:$0xf0] %v358_v46  ;;  %v357_v49 = vsel %vm356_vm6, %v351_v48, %v353_v3  ;;  %v538_v51 = vld [vmem:[#allocation4 + $0x20] sm:$0xff]  ;;  %v537_v52 = vld [vmem:[#allocation4 + $0x8] sm:$0xff] }
 0x12d   : > { %361 = vst [vmem:[#allocation4 + $0x30] sm:$0xf0] %v357_v49  ;;  %609 = vmatprep.subr.mxu0 %v538_v51 }
 0x12e   : > { %610 = vmatpush1.msra.mxu0 %v537_v52 }
 0x12f   : > { %611 = vmatprep.subr.mxu0 %v536_v53 }
 0x130   : > { %612 = vmatpush1.msra.mxu0 %v535_v54  ;;  %v534_v55 = vld [vmem:[#allocation4 + $0x10] sm:$0xff]  ;;  %v533_v56 = vld [vmem:[#allocation4 + $0x18] sm:$0xff] }
 0x131   : > { %613 = vmatprep.subr.mxu0 %v534_v55 }
 0x132   : > { %614 = vmatpush1.msra.mxu0 %v533_v56 }
 0x133   : > { %v532_v57 = vld [vmem:[#allocation4] sm:$0xff] }
 0x134   : > { %615 = vmatprep.subr.mxu0 %v532_v57  ;;  %v531_v59 = vld [vmem:[#allocation4 + $0x30] sm:$0xff] }
 0x135   : > { %616 = vmatpush1.msra.mxu0 %v531_v59 }
 0x136   : > { %2037 = vmatmul.mubr.msk.f32.vlgmr.msra.gmra.mxu0 %vm565_vm7, %v527_v58 }
 0x137   : > { %655 = vmatprep.mubr.f32.mxu0 %v2136_v1  ;;  %v553_v2 = vpop.permute.xlu0 %552 }
 0x138   : > { %v548_v61 = vpop.permute.xlu1 %547 }
 0x13a   : > { %2038 = vmatmul.mubr.msk.f32.gmra.mxu0 %vm565_vm7, %v528_v60 }
 0x13b   : > { %661 = vmatprep.mubr.f32.mxu0 %v2136_v1 }
 0x13e   : > { %2039 = vmatmul.mubr.msk.f32.gmra.mxu0 %vm565_vm7, %v529_v23 }
 0x13f   : > { %667 = vmatprep.mubr.f32.mxu0 %v2136_v1 }
 0x142   : > { %2040 = vmatmul.mubr.msk.f32.gmra.mxu0 %vm565_vm7, %v530_v24 }
 0x143   : > { %1453 = vmatprep.mubr.f32.mxu0 %v2136_v1 }
 0x1f6   : > { %v651_v62 = vpop.f32.mrf.mxu0 }
 0x1f7   : > { %v652_v63 = vadd.f32 %v651_v62, %v548_v61 }
 0x1f8   : > { %v653_v0 = vpop.f32.mrf.mxu0 }
 0x1f9   : > { %vm674_vm8 = vcmp.gt.f32.partialorder %v652_v63, 0.0  ;;  %v678_v3 = vmul.f32 0.01, %v652_v63  ;;  %v654_v4 = vadd.f32 %v653_v0, %v548_v61 }
 0x1fa   : > { %v657_v5 = vpop.f32.mrf.mxu0 }
 0x1fb   : > { %vm675_vm9 = vcmp.gt.f32.partialorder %v654_v4, 0.0  ;;  %v679_v6 = vmul.f32 0.01, %v654_v4  ;;  %v658_v7 = vadd.f32 %v657_v5, %v553_v2  ;;  %v682_v9 = vsel %vm674_vm8, %v652_v63, %v678_v3 }
 0x1fc   : > { %v659_v8 = vpop.f32.mrf.mxu0 }
 0x1fd   : > { %v660_v10 = vadd.f32 %v659_v8, %v553_v2  ;;  %vm676_vm10 = vcmp.gt.f32.partialorder %v658_v7, 0.0  ;;  %v680_v11 = vmul.f32 0.01, %v658_v7  ;;  %v683_v13 = vsel %vm675_vm9, %v654_v4, %v679_v6 }
 0x1fe   : > { %v705_v14 = vcombine.high %v682_v9, %v683_v13  ;;  %v696_v16 = vcombine.low %v682_v9, %v683_v13 }
 0x1ff   : > { %vm677_vm1 = vcmp.gt.f32.partialorder %v660_v10, 0.0  ;;  %v681_v17 = vmul.f32 0.01, %v660_v10  ;;  %v684_v18 = vsel %vm676_vm10, %v658_v7, %v680_v11 }
 0x200   : > { %706 = vrot.lane.b32.xlu0 %v705_v14, %s2137_s15  ;;  %697 = vrot.lane.b32.xlu1 %v696_v16, %s2137_s15 }
 0x201   : > { %v685_v19 = vsel %vm677_vm1, %v660_v10, %v681_v17 }
 0x202   : > { %v727_v21 = vcombine.high %v684_v18, %v685_v19  ;;  %v717_v22 = vcombine.low %v684_v18, %v685_v19 }
 0x204   : > { %728 = vrot.lane.b32.xlu1 %v727_v21, %s2137_s15  ;;  %718 = vrot.lane.b32.xlu0 %v717_v22, %s2137_s15 }
 0x272   : > { %v698_v25 = vpop.permute.xlu1 %697  ;;  %v707_v27 = vpop.permute.xlu0 %706 }
 0x273   : > { %v699_v29 = vrot.slane %v698_v25, 4  ;;  %v708_v30 = vrot.slane %v707_v27, 4 }
 0x275   : > { %v700_v31 = vsel %vm317_vm3, %v699_v29, %v698_v25  ;;  %704 = vst.msk [vmem:[#allocation3 + $0x8] sm:$0xf] %vm325_vm4, %v699_v29  ;;  %v709_v33 = vsel %vm317_vm3, %v708_v30, %v707_v27  ;;  %714 = vst.msk [vmem:[#allocation3 + $0x14] sm:$0xf] %vm325_vm4, %v708_v30 }
 0x276   : > { %703 = vst.msk [vmem:[#allocation3] sm:$0xff] %vm2234_vm5, %v700_v31  ;;  %713 = vst.msk [vmem:[#allocation3 + $0xc] sm:$0xff] %vm2234_vm5, %v709_v33  ;;  %v729_v36 = vpop.permute.xlu1 %728  ;;  %v719_v37 = vpop.permute.xlu0 %718 }
 0x277   : > { %v730_v38 = vrot.slane %v729_v36, 4  ;;  %v720_v40 = vrot.slane %v719_v37, 4 }
 0x279   : > { %v731_v41 = vsel %vm317_vm3, %v730_v38, %v729_v36  ;;  %736 = vst.msk [vmem:[#allocation3 + $0x2c] sm:$0xf] %vm325_vm4, %v730_v38  ;;  %v721_v42 = vsel %vm317_vm3, %v720_v40, %v719_v37  ;;  %726 = vst.msk [vmem:[#allocation3 + $0x20] sm:$0xf] %vm325_vm4, %v720_v40  ;;  %vm2777_vm3 = vcmask 1031168  }
 0x27a   : > { %735 = vst.msk [vmem:[#allocation3 + $0x24] sm:$0xff] %vm2234_vm5, %v731_v41  ;;  %725 = vst.msk [vmem:[#allocation3 + $0x18] sm:$0xff] %vm2234_vm5, %v721_v42  ;;  %vm1546_vm5 = vcmask 31744  }
 0x27b   : > { %vm2778_vm4 = vmmov %vm2777_vm3 }
 0x27c   : > { %v800_v44 = vld [vmem:[#allocation3 + $0x8] sm:$0xf]  ;;  %v817_v46 = vld [vmem:[#allocation3 + $0x14] sm:$0xf] }
 0x27d   : > { %808 = vrot.lane.b32.xlu1 %v800_v44, %s2143_s21  ;;  %v2367_v45 = vld [vmem:[#allocation3 + $0xc] sm:$0xff]  ;;  %v799_v48 = vld [vmem:[#allocation3] sm:$0xff]  ;;  %v1084_v49 = vld [vmem:[#allocation3 + $0x14] sm:$0xf]  ;;  %v821_v57 = vcombine.low %v817_v46, %v817_v46  ;;  %v931_v59 = vcombine.low %v800_v44, %v800_v44 }
 0x27e   : > { %824 = vrot.lane.b32.xlu0 %v2367_v45, %s2143_s21  ;;  %v1143_v51 = vcombine.low %v1084_v49, %v1084_v49  ;;  %v2377_v52 = vld [vmem:[#allocation3 + $0x8] sm:$0xf]  ;;  %v803_v53 = vcombine.high %v799_v48, %v799_v48  ;;  %v2386_v56 = vmul.f32 %v2367_v45, %v2283_v47  ;;  %v2397_v58 = vmul.f32 %v799_v48, %v2276_v43  ;;  %v780_v2 = vld [vmem:[#allocation3 + $0x14] sm:$0xf] }
 0x27f   : > { %v1156_v60 = vmul.f32 %v799_v48, %v2258_v32  ;;  %v1155_v61 = vld [vmem:[#allocation3 + $0x8] sm:$0xf]  ;;  %v2410_v63 = vcombine.low %v2367_v45, %v2367_v45  ;;  %v2415_v32 = vcombine.low %v799_v48, %v799_v48  ;;  %v1048_v33 = vmul.f32 %v2367_v45, %v2262_v34  ;;  %v1047_v37 = vld [vmem:[#allocation3 + $0x14] sm:$0xf] }
 0x280   : > { %v1157_v62 = vmul.f32 %v1155_v61, %v2252_v28  ;;  %v872_v0 = vld [vmem:[#allocation3 + $0x2c] sm:$0xf]  ;;  %v2421_v28 = vmul.f32 %v780_v2, %v2272_v39  ;;  %v954_v6 = vld [vmem:[#allocation3 + $0x8] sm:$0xf]  ;;  %v854_v8 = vld [vmem:[#allocation3 + $0x20] sm:$0xf]  ;;  %v959_v10 = vcombine.low %v2397_v58, %v2397_v58  ;;  %v785_v17 = vcombine.low %v2386_v56, %v2386_v56 }
 0x281   : > { %945 = vrot.lane.b32.xlu1 %v817_v46, %s2143_s21  ;;  %v2375_v15 = vld [vmem:[#allocation3 + $0x24] sm:$0xff]  ;;  %v763_v3 = vld [vmem:[#allocation3 + $0x2c] sm:$0xf]  ;;  %v853_v4 = vld [vmem:[#allocation3 + $0x18] sm:$0xff]  ;;  %v2431_v7 = vmul.f32 %v954_v6, %v2266_v35  ;;  %v1160_v13 = vcombine.high %v1156_v60, %v1156_v60  ;;  %v985_v18 = vcombine.low %v872_v0, %v872_v0  ;;  %v858_v23 = vcombine.low %v854_v8, %v854_v8 }
 0x282   : > { %804 = vrot.lane.b32.xlu0 %v799_v48, %s2143_s21  ;;  %v738_v54 = vmul.f32 %v2375_v15, %v2230_v12  ;;  %v942_v12 = vcombine.high %v2367_v45, %v2367_v45  ;;  %v786_v5 = vcombine.low %v2421_v28, %v2421_v28  ;;  %v745_v11 = vld [vmem:[#allocation3 + $0x20] sm:$0xf]  ;;  %v835_v19 = vld [vmem:[#allocation3 + $0x2c] sm:$0xf]  ;;  %v900_v24 = vcombine.low %v763_v3, %v763_v3 }
 0x283   : > { %v960_v9 = vcombine.low %v2431_v7, %v2431_v7  ;;  %v997_v14 = vld [vmem:[#allocation3 + $0x20] sm:$0xf]  ;;  %v2452_v22 = vmul.f32 %v835_v19, %v2272_v39  ;;  %v749_v25 = vcombine.low %v745_v11, %v745_v11  ;;  %v2462_v27 = vmul.f32 %v2375_v15, %v2283_v47 }
 0x284   : > { %v740_v55 = vcombine.high %v738_v54, %v738_v54  ;;  %742 = vst [vmem:[#allocation5 + $0xa8] sm:$0xf] %v738_v54  ;;  %v999_v16 = vmul.f32 %v997_v14, %v2266_v35  ;;  %v912_v21 = vld [vmem:[#allocation3 + $0x20] sm:$0xf]  ;;  %v857_v39 = vcombine.low %v853_v4, %v853_v4  ;;  %v998_v47 = vmul.f32 %v853_v4, %v2276_v43 }
 0x285   : > { %1092 = vrot.lane.b32.xlu1 %v1084_v49, %s2144_s22  ;;  %v914_v35 = vmul.f32 %v912_v21, %v2250_v26  ;;  %v875_v26 = vcombine.high %v2375_v15, %v2375_v15  ;;  %v973_v29 = vcombine.high %v853_v4, %v853_v4  ;;  %v984_v30 = vcombine.low %v2375_v15, %v2375_v15 }
 0x286   : > { %1146 = vrot.lane.b32.xlu0 %v1143_v51, %s2144_s22  ;;  %743 = vst [vmem:[#allocation5 + $0xe0] sm:$0xf] %v740_v55  ;;  %v913_v31 = vmul.f32 %v853_v4, %v2289_v50  ;;  %v1052_v43 = vcombine.high %v1048_v33, %v1048_v33  ;;  %v840_v36 = vcombine.high %v2462_v27, %v2462_v27 }
 0x287   : > { %v1070_v50 = vcombine.low %v2377_v52, %v2377_v52  ;;  %v1049_v34 = vmul.f32 %v1047_v37, %v2242_v20  ;;  %v1002_v40 = vcombine.high %v998_v47, %v998_v47  ;;  %v1120_v42 = vcombine.low %v999_v16, %v999_v16 }
 0x288   : > { %v1104_v49 = vcombine.high %v2397_v58, %v2397_v58 }
 0x289   : > { %1134 = vrot.lane.b32.xlu1 %v2377_v52, %s2144_s22  ;;  %v1031_v52 = vcombine.low %v2452_v22, %v2452_v22 }
 0x28a   : > { %806 = vrot.lane.b32.xlu0 %v803_v53, %s2143_s21 }
 0x28d   : > { %1088 = vrot.lane.b32.xlu1 %v2367_v45, %s2144_s22  ;;  %v917_v45 = vcombine.high %v913_v31, %v913_v31 }
 0x28e   : > { %789 = vrot.lane.b32.xlu0 %v2386_v56, %s2150_s30 }
 0x291   : > { %1073 = vrot.lane.b32.xlu1 %v799_v48, %s2144_s22 }
 0x292   : > { %943 = vrot.lane.b32.xlu0 %v942_v12, %s2143_s21 }
 0x295   : > { %826 = vrot.lane.b32.xlu1 %v821_v57, %s2143_s21  ;;  %v1030_v57 = vcombine.low %v2462_v27, %v2462_v27 }
 0x296   : > { %963 = vrot.lane.b32.xlu0 %v2397_v58, %s2149_s29 }
 0x299   : > { %934 = vrot.lane.b32.xlu1 %v931_v59, %s2143_s21 }
 0x29a   : > { %1161 = vrot.lane.b32.xlu0 %v1156_v60, %s2148_s26  ;;  %v1015_v60 = vcombine.high %v2386_v56, %v2386_v56  ;;  %v1540_v56 = vld [vmem:[%s2772_s7] sm:$0xf] }
 0x29d   : > { %1165 = vrot.lane.b32.xlu1 %v1157_v62, %s2148_s26  ;;  %v1214_v62 = vld [vmem:[%s2770_s5] sm:$0xf] }
 0x29e   : > { %1090 = vrot.lane.b32.xlu0 %v942_v12, %s2144_s22 }
 0x2a1   : > { %822 = vrot.lane.b32.xlu1 %v2410_v63, %s2143_s21 }
 0x2a2   : > { %1132 = vrot.lane.b32.xlu0 %v803_v53, %s2144_s22 }
 0x2a5   : > { %932 = vrot.lane.b32.xlu1 %v2415_v32, %s2143_s21 }
 0x2a6   : > { %880 = vrot.lane.b32.xlu0 %v872_v0, %s2143_s21 }
 0x2a9   : > { %771 = vrot.lane.b32.xlu1 %v763_v3, %s2146_s24  ;;  %v543_v3 = vld [vmem:[%s2768_s3 + $0x10] sm:$0xff] }
 0x2aa   : > { %861 = vrot.lane.b32.xlu0 %v853_v4, %s2143_s21 }
 0x2ad   : > { %791 = vrot.lane.b32.xlu1 %v786_v5, %s2150_s30 }
 0x2ae   : > { %767 = vrot.lane.b32.xlu0 %v2375_v15, %s2146_s24 }
 0x2b1   : > { %976 = vrot.lane.b32.xlu1 %v854_v8, %s2143_s21 }
 0x2b2   : > { %752 = vrot.lane.b32.xlu0 %v853_v4, %s2146_s24 }
 0x2b5   : > { %965 = vrot.lane.b32.xlu1 %v960_v9, %s2149_s29 }
 0x2b6   : > { %961 = vrot.lane.b32.xlu0 %v959_v10, %s2149_s29 }
 0x2b9   : > { %891 = vrot.lane.b32.xlu1 %v745_v11, %s2146_s24 }
 0x2ba   : > { %1163 = vrot.lane.b32.xlu0 %v1160_v13, %s2148_s26 }
 0x2bd   : > { %876 = vrot.lane.b32.xlu1 %v2375_v15, %s2143_s21  ;;  %v1119_v15 = vcombine.low %v998_v47, %v998_v47 }
 0x2be   : > { %1007 = vrot.lane.b32.xlu0 %v999_v16, %s2149_s29 }
 0x2c1   : > { %787 = vrot.lane.b32.xlu1 %v785_v17, %s2150_s30 }
 0x2c2   : > { %988 = vrot.lane.b32.xlu0 %v985_v18, %s2143_s21 }
 0x2c5   : > { %845 = vrot.lane.b32.xlu1 %v2452_v22, %s2150_s30 }
 0x2c6   : > { %922 = vrot.lane.b32.xlu0 %v914_v35, %s2147_s25 }
 0x2c9   : > { %863 = vrot.lane.b32.xlu1 %v858_v23, %s2143_s21 }
 0x2ca   : > { %903 = vrot.lane.b32.xlu0 %v900_v24, %s2146_s24 }
 0x2cd   : > { %754 = vrot.lane.b32.xlu1 %v749_v25, %s2146_s24 }
 0x2ce   : > { %841 = vrot.lane.b32.xlu0 %v2462_v27, %s2150_s30 }
 0x2d1   : > { %878 = vrot.lane.b32.xlu1 %v875_v26, %s2143_s21 }
 0x2d2   : > { %769 = vrot.lane.b32.xlu0 %v875_v26, %s2146_s24 }
 0x2d5   : > { %859 = vrot.lane.b32.xlu1 %v857_v39, %s2143_s21 }
 0x2d6   : > { %750 = vrot.lane.b32.xlu0 %v857_v39, %s2146_s24 }
 0x2d9   : > { %1003 = vrot.lane.b32.xlu1 %v998_v47, %s2149_s29 }
 0x2da   : > { %974 = vrot.lane.b32.xlu0 %v973_v29, %s2143_s21 }
 0x2dd   : > { %986 = vrot.lane.b32.xlu1 %v984_v30, %s2143_s21 }
 0x2de   : > { %918 = vrot.lane.b32.xlu0 %v913_v31, %s2147_s25 }
 0x2e1   : > { %901 = vrot.lane.b32.xlu1 %v984_v30, %s2146_s24 }
 0x2e2   : > { %889 = vrot.lane.b32.xlu0 %v973_v29, %s2146_s24 }
 0x2e5   : > { %1055 = vrot.lane.b32.xlu1 %v1052_v43, %s2145_s23 }
 0x2e6   : > { %843 = vrot.lane.b32.xlu0 %v840_v36, %s2150_s30 }
 0x2e9   : > { %1075 = vrot.lane.b32.xlu1 %v1070_v50, %s2144_s22 }
 0x2ea   : > { %1144 = vrot.lane.b32.xlu0 %v2410_v63, %s2144_s22 }
 0x2ed   : > { %1053 = vrot.lane.b32.xlu1 %v1048_v33, %s2145_s23 }
 0x2ee   : > { %1057 = vrot.lane.b32.xlu0 %v1049_v34, %s2145_s23 }
 0x2ef   : > { %v809_v38 = vpop.permute.xlu1 %808 }
 0x2f0   : > { %v2497_v41 = vpop.permute.xlu0 %824 }
 0x2f1   : > { %1005 = vrot.lane.b32.xlu1 %v1002_v40, %s2149_s29 }
 0x2f2   : > { %1123 = vrot.lane.b32.xlu0 %v1120_v42, %s2149_s29 }
 0x2f3   : > { %v946_v44 = vpop.permute.xlu1 %945 }
 0x2f4   : > { %v2501_v46 = vpop.permute.xlu0 %804 }
 0x2f5   : > { %920 = vrot.lane.b32.xlu1 %v917_v45, %s2147_s25 }
 0x2f6   : > { %1071 = vrot.lane.b32.xlu0 %v2415_v32, %s2144_s22 }
 0x2f7   : > { %v1093_v20 = vpop.permute.xlu1 %1092 }
 0x2f8   : > { %v1147_v48 = vpop.permute.xlu0 %1146 }
 0x2f9   : > { %1107 = vrot.lane.b32.xlu1 %v2431_v7, %s2149_s29 }
 0x2fa   : > { %1105 = vrot.lane.b32.xlu0 %v1104_v49, %s2149_s29 }
 0x2fb   : > { %v1135_v51 = vpop.permute.xlu1 %1134 }
 0x2fc   : > { %v807_v53 = vpop.permute.xlu0 %806 }
 0x2fd   : > { %v810_v54 = vsel %vm431_vm12, %v2501_v46, %v807_v53  ;;  %v811_v55 = vsel %vm431_vm12, %v807_v53, %v809_v38  ;;  %1121 = vrot.lane.b32.xlu1 %v1119_v15, %s2149_s29 }
 0x2fe   : > { %814 = vst [vmem:[#allocation5 + $0x78] sm:$0xf] %v810_v54  ;;  %815 = vst [vmem:[#allocation5 + $0xa0] sm:$0xf] %v811_v55  ;;  %1034 = vrot.lane.b32.xlu0 %v1031_v52, %s2150_s30 }
 0x2ff   : > { %1100 = vst [vmem:[#allocation5 + $0x18] sm:$0xf] %v810_v54  ;;  %1101 = vst [vmem:[#allocation5 + $0x110] sm:$0xf] %v811_v55  ;;  %v2518_v12 = vpop.permute.xlu1 %1088 }
 0x300   : > { %v1149_v58 = vsel %vm495_vm11, %v2518_v12, %v1147_v48  ;;  %v2524_v59 = vpop.permute.xlu0 %789 }
 0x301   : > { %1153 = vst [vmem:[#allocation5] sm:$0xf0] %v1149_v58  ;;  %1032 = vrot.lane.b32.xlu1 %v1030_v57, %s2150_s30 }
 0x302   : > { %1016 = vrot.lane.b32.xlu0 %v1015_v60, %s2150_s30 }
 0x303   : > { %v2530_v61 = vpop.permute.xlu1 %1073 }
 0x304   : > { %v944_v63 = vpop.permute.xlu0 %943 }
 0x305   : > { %v947_v32 = vsel %vm431_vm12, %v2497_v41, %v944_v63  ;;  %v948_v0 = vsel %vm431_vm12, %v944_v63, %v946_v44  ;;  %1018 = vrot.lane.b32.xlu1 %v2421_v28, %s2150_s30  ;;  %v544_v28 = vld [vmem:[%s2768_s3 + $0x18] sm:$0xff] }
 0x306   : > { %951 = vst [vmem:[#allocation5 + $0x98] sm:$0xf] %v947_v32  ;;  %952 = vst [vmem:[#allocation5 + $0xf8] sm:$0xf] %v948_v0  ;;  %1217 = vperm.xlu0 %2093, %v1214_v62  }
 0x307   : > { %1028 = vst [vmem:[#allocation5 + $0x60] sm:$0xf] %v947_v32  ;;  %1029 = vst [vmem:[#allocation5 + $0x70] sm:$0xf] %v948_v0  ;;  %v827_v2 = vpop.permute.xlu1 %826 }
 0x308   : > { %v829_v4 = vsel %vm431_vm12, %v2497_v41, %v827_v2  ;;  %v2548_v5 = vpop.permute.xlu0 %963 }
 0x309   : > { %833 = vst [vmem:[#allocation5 + $0xa0] sm:$0xf0] %v829_v4  ;;  %1103 = vst [vmem:[#allocation5 + $0x110] sm:$0xf0] %v829_v4  ;;  %1543 = vperm.xlu1 %2094, %v1540_v56  }
 0x30a   : > { %557 = vperm.xlu0 %2093, %v543_v3  }
 0x30b   : > { %v935_v6 = vpop.permute.xlu1 %934 }
 0x30c   : > { %v937_v7 = vsel %vm431_vm12, %v2501_v46, %v935_v6  ;;  %v1162_v8 = vpop.permute.xlu0 %1161 }
 0x30d   : > { %941 = vst [vmem:[#allocation5 + $0x58] sm:$0xf0] %v937_v7  ;;  %1027 = vst [vmem:[#allocation5 + $0x130] sm:$0xf0] %v937_v7  ;;  %562 = vperm.xlu1 %2094, %v544_v28  }
 0x30f   : > { %v1166_v9 = vpop.permute.xlu1 %1165 }
 0x310   : > { %v1091_v10 = vpop.permute.xlu0 %1090 }
 0x311   : > { %v1094_v11 = vsel %vm495_vm11, %v2518_v12, %v1091_v10  ;;  %v1095_v13 = vsel %vm495_vm11, %v1091_v10, %v1093_v20 }
 0x312   : > { %1098 = vst [vmem:[#allocation5 + $0xd0] sm:$0xf] %v1094_v11  ;;  %1099 = vst [vmem:[#allocation5 + $0x8] sm:$0xf] %v1095_v13 }
 0x313   : > { %v823_v14 = vpop.permute.xlu1 %822 }
 0x314   : > { %v828_v16 = vsel %vm431_vm12, %v823_v14, %v2497_v41  ;;  %v1133_v17 = vpop.permute.xlu0 %1132 }
 0x315   : > { %832 = vst [vmem:[#allocation5 + $0x78] sm:$0xf0] %v828_v16  ;;  %1102 = vst [vmem:[#allocation5 + $0x18] sm:$0xf0] %v828_v16  ;;  %v1136_v18 = vsel %vm495_vm11, %v2530_v61, %v1133_v17  ;;  %v1137_v19 = vsel %vm495_vm11, %v1133_v17, %v1135_v51 }
 0x316   : > { %1140 = vst [vmem:[#allocation5 + $0xc0] sm:$0xf] %v1136_v18  ;;  %1141 = vst [vmem:[#allocation5] sm:$0xf] %v1137_v19 }
 0x317   : > { %v933_v21 = vpop.permute.xlu1 %932 }
 0x318   : > { %v936_v22 = vsel %vm431_vm12, %v933_v21, %v2501_v46  ;;  %v881_v35 = vpop.permute.xlu0 %880 }
 0x319   : > { %940 = vst [vmem:[#allocation5 + $0x20] sm:$0xf0] %v936_v22  ;;  %1026 = vst [vmem:[#allocation5 + $0x50] sm:$0xf0] %v936_v22  ;;  %v1211_v23 = vld [vmem:[#allocation5 + $0x8] sm:$0xf] }
 0x31a   : > { %v1210_v24 = vld [vmem:[#allocation5 + $0xd0] sm:$0xf]  ;;  %2047 = vmatprep.subr.msk.mxu0 %vm578_vm2, %v1211_v23 }
 0x31b   : > { %v772_v25 = vpop.permute.xlu1 %771  ;;  %2048 = vmatpush1.msk.msra.mxu0 %vm578_vm2, %v1210_v24 }
 0x31c   : > { %v2567_v27 = vpop.permute.xlu0 %861 }
 0x31f   : > { %v792_v26 = vpop.permute.xlu1 %791 }
 0x320   : > { %v794_v39 = vsel %vm417_vm14, %v2524_v59, %v792_v26  ;;  %v2571_v47 = vpop.permute.xlu0 %767 }
 0x321   : > { %798 = vst [vmem:[#allocation5 + $0xe8] sm:$0xf0] %v794_v39 }
 0x323   : > { %v977_v29 = vpop.permute.xlu1 %976 }
 0x324   : > { %v2573_v30 = vpop.permute.xlu0 %752 }
 0x327   : > { %v966_v31 = vpop.permute.xlu1 %965 }
 0x328   : > { %v968_v33 = vsel %vm457_vm13, %v2548_v5, %v966_v31  ;;  %v962_v43 = vpop.permute.xlu0 %961 }
 0x329   : > { %972 = vst [vmem:[#allocation5 + $0xf8] sm:$0xf0] %v968_v33  ;;  %v967_v36 = vsel %vm457_vm13, %v962_v43, %v2548_v5 }
 0x32a   : > { %971 = vst [vmem:[#allocation5 + $0x98] sm:$0xf0] %v967_v36  ;;  %v1191_v36 = vld [vmem:[#allocation5 + $0xa0] sm:$0xff] }
 0x32b   : > { %v2579_v50 = vpop.permute.xlu1 %891 }
 0x32c   : > { %v1164_v37 = vpop.permute.xlu0 %1163 }
 0x32d   : > { %v1167_v34 = vsel %vm520_vm15, %v1162_v8, %v1164_v37  ;;  %v1168_v38 = vsel %vm520_vm15, %v1164_v37, %v1166_v9 }
 0x32e   : > { %1171 = vst [vmem:[#allocation5 + $0xb8] sm:$0xf] %v1167_v34  ;;  %1172 = vst [vmem:[#allocation5 + $0xb0] sm:$0xf] %v1168_v38  ;;  %v1190_v34 = vld [vmem:[#allocation5 + $0x78] sm:$0xff] }
 0x32f   : > { %v877_v40 = vpop.permute.xlu1 %876 }
 0x330   : > { %v2583_v41 = vpop.permute.xlu0 %1007 }
 0x333   : > { %v788_v42 = vpop.permute.xlu1 %787 }
 0x334   : > { %v793_v44 = vsel %vm417_vm14, %v788_v42, %v2524_v59  ;;  %v989_v45 = vpop.permute.xlu0 %988 }
 0x335   : > { %797 = vst [vmem:[#allocation5 + $0x10] sm:$0xf0] %v793_v44  ;;  %v991_v46 = vsel %vm431_vm12, %v877_v40, %v989_v45 }
 0x336   : > { %995 = vst [vmem:[#allocation5 + $0x68] sm:$0xf0] %v991_v46  ;;  %1045 = vst [vmem:[#allocation5 + $0xd8] sm:$0xf0] %v991_v46 }
 0x337   : > { %v846_v20 = vpop.permute.xlu1 %845 }
 0x338   : > { %v2588_v48 = vpop.permute.xlu0 %922 }
 0x33b   : > { %v864_v49 = vpop.permute.xlu1 %863 }
 0x33c   : > { %v866_v51 = vsel %vm431_vm12, %v2567_v27, %v864_v49  ;;  %v904_v15 = vpop.permute.xlu0 %903 }
 0x33d   : > { %870 = vst [vmem:[#allocation5 + $0x118] sm:$0xf0] %v866_v51  ;;  %1116 = vst [vmem:[#allocation5 + $0xc8] sm:$0xf0] %v866_v51  ;;  %v906_v52 = vsel %vm356_vm6, %v2571_v47, %v904_v15 }
 0x33e   : > { %910 = vst [vmem:[#allocation5 + $0x120] sm:$0xf0] %v906_v52 }
 0x33f   : > { %v755_v53 = vpop.permute.xlu1 %754 }
 0x340   : > { %v757_v54 = vsel %vm356_vm6, %v2573_v30, %v755_v53  ;;  %v2596_v55 = vpop.permute.xlu0 %841 }
 0x341   : > { %761 = vst [vmem:[#allocation5 + $0xe0] sm:$0xf0] %v757_v54 }
 0x343   : > { %v879_v57 = vpop.permute.xlu1 %878 }
 0x344   : > { %v882_v58 = vsel %vm431_vm12, %v877_v40, %v879_v57  ;;  %v883_v60 = vsel %vm431_vm12, %v879_v57, %v881_v35  ;;  %v770_v62 = vpop.permute.xlu0 %769 }
 0x345   : > { %886 = vst [vmem:[#allocation5 + $0x100] sm:$0xf] %v882_v58  ;;  %887 = vst [vmem:[#allocation5 + $0x30] sm:$0xf] %v883_v60  ;;  %v773_v63 = vsel %vm356_vm6, %v2571_v47, %v770_v62  ;;  %v774_v32 = vsel %vm356_vm6, %v770_v62, %v772_v25 }
 0x346   : > { %1117 = vst [vmem:[#allocation5 + $0x40] sm:$0xf] %v882_v58  ;;  %1118 = vst [vmem:[#allocation5 + $0x88] sm:$0xf] %v883_v60 }
 0x347   : > { %777 = vst [vmem:[#allocation5 + $0x10] sm:$0xf] %v773_v63  ;;  %778 = vst [vmem:[#allocation5 + $0xe8] sm:$0xf] %v774_v32  ;;  %v860_v0 = vpop.permute.xlu1 %859 }
 0x348   : > { %v865_v56 = vsel %vm431_vm12, %v860_v0, %v2567_v27  ;;  %v751_v2 = vpop.permute.xlu0 %750  ;;  %v1175_v45 = vld [vmem:[#allocation5 + $0xe0] sm:$0xff] }
 0x349   : > { %869 = vst [vmem:[#allocation5 + $0x48] sm:$0xf0] %v865_v56  ;;  %1115 = vst [vmem:[#allocation5 + $0x90] sm:$0xf0] %v865_v56  ;;  %v756_v3 = vsel %vm356_vm6, %v751_v2, %v2573_v30  ;;  %v1193_v56 = vld [vmem:[#allocation5 + $0xf8] sm:$0xff] }
 0x34a   : > { %760 = vst [vmem:[#allocation5 + $0xa8] sm:$0xf0] %v756_v3  ;;  %v1192_v2 = vld [vmem:[#allocation5 + $0x98] sm:$0xff] }
 0x34b   : > { %v2607_v4 = vpop.permute.xlu1 %1003 }
 0x34c   : > { %v975_v28 = vpop.permute.xlu0 %974  ;;  %v1207_v6 = vld [vmem:[#allocation5 + $0x30] sm:$0xf]  ;;  %v1206_v7 = vld [vmem:[#allocation5 + $0x100] sm:$0xf] }
 0x34d   : > { %v978_v8 = vsel %vm431_vm12, %v2567_v27, %v975_v28  ;;  %v979_v9 = vsel %vm431_vm12, %v975_v28, %v977_v29  ;;  %2041 = vmatprep.subr.msk.mxu1 %vm578_vm2, %v1207_v6 }
 0x34e   : > { %982 = vst [vmem:[#allocation5 + $0x28] sm:$0xf] %v978_v8  ;;  %983 = vst [vmem:[#allocation5 + $0x68] sm:$0xf] %v979_v9  ;;  %2042 = vmatpush1.msk.msra.mxu1 %vm578_vm2, %v1206_v7  ;;  %v1182_v42 = vld [vmem:[#allocation5 + $0x10] sm:$0xff] }
 0x34f   : > { %1042 = vst [vmem:[#allocation5 + $0x80] sm:$0xf] %v978_v8  ;;  %1043 = vst [vmem:[#allocation5 + $0xd8] sm:$0xf] %v979_v9  ;;  %v987_v10 = vpop.permute.xlu1 %986 }
 0x350   : > { %v990_v11 = vsel %vm431_vm12, %v987_v10, %v877_v40  ;;  %v919_v13 = vpop.permute.xlu0 %918  ;;  %v1183_v40 = vld [vmem:[#allocation5 + $0xe8] sm:$0xff] }
 0x351   : > { %994 = vst [vmem:[#allocation5 + $0x28] sm:$0xf0] %v990_v11  ;;  %1044 = vst [vmem:[#allocation5 + $0x80] sm:$0xf0] %v990_v11  ;;  %v1174_v51 = vld [vmem:[#allocation5 + $0xa8] sm:$0xff] }
 0x353   : > { %v902_v14 = vpop.permute.xlu1 %901 }
 0x354   : > { %v905_v16 = vsel %vm356_vm6, %v902_v14, %v2571_v47  ;;  %v890_v17 = vpop.permute.xlu0 %889 }
 0x355   : > { %909 = vst [vmem:[#allocation5 + $0x38] sm:$0xf0] %v905_v16  ;;  %v893_v18 = vsel %vm356_vm6, %v2573_v30, %v890_v17  ;;  %v894_v19 = vsel %vm356_vm6, %v890_v17, %v2579_v50  ;;  %v1213_v16 = vld [vmem:[#allocation5 + $0xb0] sm:$0xf] }
 0x356   : > { %897 = vst [vmem:[#allocation5 + $0x38] sm:$0xf] %v893_v18  ;;  %898 = vst [vmem:[#allocation5 + $0x120] sm:$0xf] %v894_v19  ;;  %v1195_v6 = vld [vmem:[#allocation5 + $0xd8] sm:$0xff]  ;;  %v1205_v19 = vld [vmem:[#allocation5] sm:$0xff] }
 0x357   : > { %v1056_v21 = vpop.permute.xlu1 %1055 }
 0x358   : > { %v844_v22 = vpop.permute.xlu0 %843  ;;  %v1200_v63 = vld [vmem:[#allocation5 + $0x28] sm:$0xff] }
 0x359   : > { %v847_v35 = vsel %vm417_vm14, %v2596_v55, %v844_v22  ;;  %v848_v23 = vsel %vm417_vm14, %v844_v22, %v846_v20 }
 0x35a   : > { %851 = vst [vmem:[#allocation5 + $0x48] sm:$0xf] %v847_v35  ;;  %852 = vst [vmem:[#allocation5 + $0x118] sm:$0xf] %v848_v23 }
 0x35b   : > { %v1076_v24 = vpop.permute.xlu1 %1075 }
 0x35c   : > { %v1078_v25 = vsel %vm495_vm11, %v2530_v61, %v1076_v24  ;;  %v1145_v27 = vpop.permute.xlu0 %1144 }
 0x35d   : > { %1082 = vst [vmem:[#allocation5 + $0x138] sm:$0xf0] %v1078_v25  ;;  %v1148_v26 = vsel %vm495_vm11, %v1145_v27, %v2518_v12  ;;  %v1177_v11 = vld [vmem:[#allocation5 + $0x120] sm:$0xff]  ;;  %v1176_v14 = vld [vmem:[#allocation5 + $0x38] sm:$0xff]  ;;  %v1181_v27 = vld [vmem:[#allocation5 + $0x110] sm:$0xff] }
 0x35e   : > { %1152 = vst [vmem:[#allocation5 + $0xc0] sm:$0xf0] %v1148_v26  ;;  %v1180_v26 = vld [vmem:[#allocation5 + $0x18] sm:$0xff] }
 0x35f   : > { %v1054_v39 = vpop.permute.xlu1 %1053 }
 0x360   : > { %v1059_v47 = vsel %vm482_vm0, %v1054_v39, %v1056_v21  ;;  %v1058_v29 = vpop.permute.xlu0 %1057 }
 0x361   : > { %1063 = vst [vmem:[#allocation5 + $0x128] sm:$0xf] %v1059_v47  ;;  %v1060_v30 = vsel %vm482_vm0, %v1056_v21, %v1058_v29  ;;  %v1199_v31 = vld [vmem:[#allocation5 + $0x118] sm:$0xff]  ;;  %v1198_v33 = vld [vmem:[#allocation5 + $0x48] sm:$0xff] }
 0x362   : > { %1064 = vst [vmem:[#allocation5 + $0x138] sm:$0xf] %v1060_v30  ;;  %1271 = vmatprep.subr.mxu1 %v1199_v31 }
 0x363   : > { %v1006_v43 = vpop.permute.xlu1 %1005  ;;  %1272 = vmatpush1.msra.mxu1 %v1198_v33 }
 0x364   : > { %v1009_v50 = vsel %vm457_vm13, %v2607_v4, %v1006_v43  ;;  %v1010_v12 = vsel %vm457_vm13, %v1006_v43, %v2583_v41  ;;  %1273 = vmatprep.subr.mxu1 %v1191_v36  ;;  %v1124_v37 = vpop.permute.xlu0 %1123  ;;  %v2639_v41 = vld [vmem:[%s2769_s4] sm:$0xf] }
 0x365   : > { %1013 = vst [vmem:[#allocation5 + $0xf0] sm:$0xf] %v1009_v50  ;;  %1014 = vst [vmem:[#allocation5 + $0x108] sm:$0xf] %v1010_v12  ;;  %v1126_v38 = vsel %vm457_vm13, %v2607_v4, %v1124_v37  ;;  %1274 = vmatpush1.msra.mxu1 %v1190_v34  ;;  %v1204_v21 = vld [vmem:[#allocation5 + $0xc0] sm:$0xff]  ;;  %v663_v37 = vpop.f32.mrf.mxu0 }
 0x366   : > { %1130 = vst [vmem:[#allocation5 + $0x88] sm:$0xf0] %v1126_v38  ;;  %1275 = vmatprep.subr.mxu1 %v1183_v40  ;;  %v1531_v12 = vld [vmem:[%s2771_s6] sm:$0xf] }
 0x367   : > { %v921_v44 = vpop.permute.xlu1 %920  ;;  %1276 = vmatpush1.msra.mxu1 %v1182_v42  ;;  %v2689_v38 = vpop.f32.mrf.mxu0 }
 0x368   : > { %v924_v46 = vsel %vm2777_vm3, %v919_v13, %v921_v44  ;;  %v925_v20 = vsel %vm2778_vm4, %v921_v44, %v2588_v48  ;;  %1277 = vmatprep.subr.mxu1 %v1175_v45  ;;  %v1072_v49 = vpop.permute.xlu0 %1071 }
 0x369   : > { %928 = vst [vmem:[#allocation5 + $0x20] sm:$0xf] %v924_v46  ;;  %929 = vst [vmem:[#allocation5 + $0x58] sm:$0xf] %v925_v20  ;;  %v1077_v15 = vsel %vm495_vm11, %v1072_v49, %v2530_v61  ;;  %1278 = vmatpush1.msra.mxu1 %v1174_v51  ;;  %v1203_v52 = vld [vmem:[#allocation5 + $0x138] sm:$0xff]  ;;  %v1201_v61 = vld [vmem:[#allocation5 + $0x68] sm:$0xff] }
 0x36a   : > { %1081 = vst [vmem:[#allocation5 + $0x128] sm:$0xf0] %v1077_v15  ;;  %2043 = vmatmul.mubr.msk.f32.vlgmr.msra.gmra.mxu1 %vm565_vm7, %v2639_v41  ;;  %1413 = vmatprep.subr.mxu0 %v1203_v52 }
 0x36b   : > { %v1108_v53 = vpop.permute.xlu1 %1107  ;;  %1382 = vmatprep.mubr.f32.mxu1 %v2136_v1 }
 0x36c   : > { %v1106_v54 = vpop.permute.xlu0 %1105  ;;  %v1209_v48 = vld [vmem:[#allocation5 + $0x108] sm:$0xf]  ;;  %v1208_v57 = vld [vmem:[#allocation5 + $0xf0] sm:$0xf] }
 0x36d   : > { %v1109_v58 = vsel %vm457_vm13, %v2548_v5, %v1106_v54  ;;  %v1110_v60 = vsel %vm457_vm13, %v1106_v54, %v1108_v53  ;;  %2044 = vmatprep.subr.msk.mxu1 %vm578_vm2, %v1209_v48  ;;  %v1197_v22 = vld [vmem:[#allocation5 + $0x88] sm:$0xff] }
 0x36e   : > { %1113 = vst [vmem:[#allocation5 + $0x90] sm:$0xf] %v1109_v58  ;;  %1114 = vst [vmem:[#allocation5 + $0xc8] sm:$0xf] %v1110_v60  ;;  %2045 = vmatpush1.msk.msra.mxu1 %vm578_vm2, %v1208_v57 }
 0x36f   : > { %v1122_v62 = vpop.permute.xlu1 %1121  ;;  %1342 = vmatprep.subr.mxu1 %v1201_v61 }
 0x370   : > { %v1125_v32 = vsel %vm457_vm13, %v1122_v62, %v2607_v4  ;;  %1343 = vmatpush1.msra.mxu1 %v1200_v63  ;;  %v1035_v0 = vpop.permute.xlu0 %1034  ;;  %v1185_v28 = vld [vmem:[#allocation5 + $0x58] sm:$0xff]  ;;  %v1184_v8 = vld [vmem:[#allocation5 + $0x20] sm:$0xff] }
 0x371   : > { %1129 = vst [vmem:[#allocation5 + $0x40] sm:$0xf0] %v1125_v32  ;;  %v1037_v5 = vsel %vm417_vm14, %v2596_v55, %v1035_v0  ;;  %1344 = vmatprep.subr.mxu1 %v1193_v56  ;;  %v1202_v3 = vld [vmem:[#allocation5 + $0x128] sm:$0xff]  ;;  %v1194_v4 = vld [vmem:[#allocation5 + $0x80] sm:$0xff] }
 0x372   : > { %1041 = vst [vmem:[#allocation5 + $0x70] sm:$0xf0] %v1037_v5  ;;  %1345 = vmatpush1.msra.mxu1 %v1192_v2  ;;  %1414 = vmatpush1.msra.mxu0 %v1202_v3 }
 0x373   : > { %v1033_v7 = vpop.permute.xlu1 %1032  ;;  %1346 = vmatprep.subr.mxu1 %v1185_v28  ;;  %1415 = vmatprep.subr.mxu0 %v1195_v6 }
 0x374   : > { %v1036_v9 = vsel %vm417_vm14, %v1033_v7, %v2596_v55  ;;  %1347 = vmatpush1.msra.mxu1 %v1184_v8  ;;  %1416 = vmatpush1.msra.mxu0 %v1194_v4  ;;  %v1017_v10 = vpop.permute.xlu0 %1016  ;;  %v1212_v55 = vld [vmem:[#allocation5 + $0xb8] sm:$0xf] }
 0x375   : > { %1040 = vst [vmem:[#allocation5 + $0x60] sm:$0xf0] %v1036_v9  ;;  %v1020_v13 = vsel %vm417_vm14, %v2524_v59, %v1017_v10  ;;  %1348 = vmatprep.subr.mxu1 %v1177_v11  ;;  %v1189_v24 = vld [vmem:[#allocation5 + $0xc8] sm:$0xff]  ;;  %v1188_v25 = vld [vmem:[#allocation5 + $0x90] sm:$0xff] }
 0x376   : > { %1024 = vst [vmem:[#allocation5 + $0x50] sm:$0xf] %v1020_v13  ;;  %1349 = vmatpush1.msra.mxu1 %v1176_v14 }
 0x377   : > { %v1019_v17 = vpop.permute.xlu1 %1018  ;;  %2046 = vmatmul.mubr.msk.f32.vlgmr.msra.gmra.mxu1 %vm565_vm7, %v2639_v41  ;;  %2050 = vmatprep.subr.msk.mxu1 %vm578_vm2, %v1213_v16 }
 0x378   : > { %v1021_v18 = vsel %vm417_vm14, %v1017_v10, %v1019_v17  ;;  %2051 = vmatpush1.msk.msra.mxu1 %vm578_vm2, %v1212_v55  ;;  %1524 = vmatprep.mubr.f32.mxu1 %v2136_v1  ;;  %v1196_v35 = vld [vmem:[#allocation5 + $0x40] sm:$0xff] }
 0x379   : > { %1025 = vst [vmem:[#allocation5 + $0x130] sm:$0xf] %v1021_v18  ;;  %1484 = vmatprep.subr.mxu1 %v1205_v19  ;;  %v1187_v59 = vld [vmem:[#allocation5 + $0x70] sm:$0xff] }
 0x37a   : > { %1417 = vmatprep.subr.mxu0 %v1187_v59  ;;  %1485 = vmatpush1.msra.mxu1 %v1204_v21 }
 0x37b   : > { %1486 = vmatprep.subr.mxu1 %v1197_v22 }
 0x37c   : > { %1487 = vmatpush1.msra.mxu1 %v1196_v35  ;;  %v1186_v23 = vld [vmem:[#allocation5 + $0x60] sm:$0xff] }
 0x37d   : > { %1418 = vmatpush1.msra.mxu0 %v1186_v23  ;;  %1488 = vmatprep.subr.mxu1 %v1189_v24  ;;  %v1178_v47 = vld [vmem:[#allocation5 + $0x50] sm:$0xff] }
 0x37e   : > { %1489 = vmatpush1.msra.mxu1 %v1188_v25 }
 0x37f   : > { %1490 = vmatprep.subr.mxu1 %v1181_v27 }
 0x380   : > { %1491 = vmatpush1.msra.mxu1 %v1180_v26  ;;  %v1179_v39 = vld [vmem:[#allocation5 + $0x130] sm:$0xff] }
 0x381   : > { %1419 = vmatprep.subr.mxu0 %v1179_v39  ;;  %2052 = vmatmul.mubr.msk.f32.vlgmr.msra.gmra.mxu1 %vm565_vm7, %v2639_v41  ;;  %v1218_v30 = vpop.permute.xlu0 %1217 }
 0x382   : > { %1420 = vmatpush1.msra.mxu0 %v1178_v47  ;;  %1780 = vmatprep.mubr.f32.mxu1 %v2136_v1 }
 0x383   : > { %2049 = vmatmul.mubr.msk.f32.vlgmr.msra.gmra.mxu0 %vm565_vm7, %v2639_v41  ;;  %v2697_v41 = vpop.f32.mrf.mxu0 }
 0x384   : > { %1638 = vmatprep.mubr.f32.mxu0 %v2136_v1  ;;  %v1544_v62 = vpop.permute.xlu1 %1543 }
 0x385   : > { %v2704_v20 = vpop.f32.mrf.mxu0  ;;  %v558_v11 = vpop.permute.xlu0 %557 }
 0x386   : > { %v664_v18 = vadd.f32 %v663_v37, %v558_v11  ;;  %v666_v23 = vadd.f32 %v2689_v38, %v558_v11 }
 0x42a   : > { %v1313_v29 = vpop.f32.mrf.mxu1 }
 0x42b   : > { %v2674_v31 = vadd.f32 %v1313_v29, %v1218_v30 }
 0x42c   : > { %v1315_v33 = vpop.f32.mrf.mxu1 }
 0x42d   : > { %v2676_v43 = vadd.f32 %v1315_v33, %v1218_v30  ;;  %v1532_v50 = vmul.f32 %v2674_v31, %v2674_v31 }
 0x42f   : > { %v1533_v36 = vmul.f32 %v2676_v43, %v2676_v43 }
 0x431   : > { %2053 = vmatprep.subr.msk.mxu0 %vm578_vm2, %v1533_v36 }
 0x432   : > { %2054 = vmatpush1.msk.msra.mxu0 %vm578_vm2, %v1532_v50 }
 0x433   : > { %2055 = vmatmul.mubr.msk.f32.vlgmr.msra.gmra.mxu0 %vm1546_vm5, %v1531_v12 }
 0x434   : > { %1709 = vmatprep.mubr.f32.mxu0 %v2136_v1 }
 0x437   : > { %v1384_v34 = vpop.f32.mrf.mxu1 }
 0x438   : > { %v2691_v40 = vadd.f32 %v1384_v34, %v1218_v30 }
 0x439   : > { %v1386_v42 = vpop.f32.mrf.mxu1 }
 0x43a   : > { %v2693_v44 = vadd.f32 %v1386_v42, %v1218_v30  ;;  %v1534_v46 = vmul.f32 %v2691_v40, %v2691_v40 }
 0x43c   : > { %v1535_v45 = vmul.f32 %v2693_v44, %v2693_v44 }
 0x43e   : > { %2056 = vmatprep.subr.msk.mxu0 %vm578_vm2, %v1535_v45 }
 0x43f   : > { %2057 = vmatpush1.msk.msra.mxu0 %vm578_vm2, %v1534_v46 }
 0x440   : > { %2058 = vmatmul.mubr.msk.f32.vlgmr.msra.gmra.mxu0 %vm1546_vm5, %v1531_v12 }
 0x441   : > { %v1526_v49 = vpop.f32.mrf.mxu1  ;;  %1851 = vmatprep.mubr.f32.mxu0 %v2136_v1 }
 0x442   : > { %v2707_v51 = vadd.f32 %v1526_v49, %v1218_v30 }
 0x443   : > { %v1455_v15 = vpop.f32.mrf.mxu0  ;;  %v1528_v52 = vpop.f32.mrf.mxu1 }
 0x444   : > { %v2709_v53 = vadd.f32 %v1528_v52, %v1218_v30  ;;  %v2711_v54 = vadd.f32 %v1455_v15, %v1218_v30  ;;  %v1538_v60 = vmul.f32 %v2707_v51, %v2707_v51  ;;  %v1936_v15 = vrot.slane %v664_v18, 4 }
 0x445   : > { %v1457_v48 = vpop.f32.mrf.mxu0 }
 0x446   : > { %v1539_v57 = vmul.f32 %v2709_v53, %v2709_v53  ;;  %v2715_v58 = vadd.f32 %v1457_v48, %v1218_v30  ;;  %v1536_v61 = vmul.f32 %v2711_v54, %v2711_v54 }
 0x448   : > { %v1537_v1 = vmul.f32 %v2715_v58, %v2715_v58  ;;  %2062 = vmatprep.subr.msk.mxu0 %vm578_vm2, %v1539_v57 }
 0x449   : > { %2063 = vmatpush1.msk.msra.mxu0 %vm578_vm2, %v1538_v60  ;;  %v563_v60 = vpop.permute.xlu1 %562 }
 0x44a   : > { %2059 = vmatprep.subr.msk.mxu1 %vm578_vm2, %v1537_v1  ;;  %2064 = vmatmul.mubr.msk.f32.vlgmr.msra.gmra.mxu0 %vm1546_vm5, %v1531_v12 }
 0x44b   : > { %2060 = vmatpush1.msk.msra.mxu1 %vm578_vm2, %v1536_v61 }
 0x44c   : > { %2061 = vmatmul.mubr.msk.f32.vlgmr.msra.gmra.mxu1 %vm1546_vm5, %v1531_v12 }
 0x4f3   : > { %v1640_v63 = vpop.f32.mrf.mxu0 }
 0x4f4   : > { %v1641_v32 = vadd.f32 %v1640_v63, %v1544_v62 }
 0x4f5   : > { %v1642_v0 = vpop.f32.mrf.mxu0 }
 0x4f6   : > { %v1858_v56 = vmax.f32 %v1641_v32, 0.0  ;;  %v1643_v5 = vadd.f32 %v1642_v0, %v1544_v62 }
 0x4f8   : > { %2112 = vrsqrt.f32 %v1858_v56  ;;  %v1859_v2 = vmax.f32 %v1643_v5, 0.0  ;;  %vm1868_vm11 = vcmp.eq.f32.partialorder %v1858_v56, inf  ;;  %v1871_v13 = vand.u32 2147483648, %v1858_v56 }
 0x4f9   : > { %vm1870_vm12 = vcmp.eq.f32.partialorder %v1858_v56, 0.0 }
 0x4fa   : > { %2114 = vrsqrt.f32 %v1859_v2  ;;  %vm1875_vm13 = vcmp.eq.f32.partialorder %v1859_v2, inf  ;;  %v1878_v59 = vand.u32 2147483648, %v1859_v2  ;;  %vm1877_vm14 = vcmp.eq.f32.partialorder %v1859_v2, 0.0 }
 0x500   : > { %v1711_v3 = vpop.f32.mrf.mxu0 }
 0x501   : > { %v1712_v28 = vadd.f32 %v1711_v3, %v1544_v62 }
 0x502   : > { %v1713_v6 = vpop.f32.mrf.mxu0 }
 0x503   : > { %v1860_v7 = vmax.f32 %v1712_v28, 0.0  ;;  %v1714_v8 = vadd.f32 %v1713_v6, %v1544_v62 }
 0x505   : > { %v2113_v4 = vpop.eup %2112  ;;  %2116 = vrsqrt.f32 %v1860_v7  ;;  %v1861_v10 = vmax.f32 %v1714_v8, 0.0  ;;  %vm1882_vm15 = vcmp.eq.f32.partialorder %v1860_v7, inf  ;;  %v1885_v38 = vand.u32 2147483648, %v1860_v7 }
 0x506   : > { %v1867_v9 = vmul.f32 %v2113_v4, %v1858_v56  ;;  %vm1884_vm0 = vcmp.eq.f32.partialorder %v1860_v7, 0.0  ;;  %v672_v8 = vadd.f32 %v2704_v20, %v563_v60 }
 0x507   : > { %v2115_v14 = vpop.eup %2114  ;;  %2118 = vrsqrt.f32 %v1861_v10  ;;  %vm1889_vm1 = vcmp.eq.f32.partialorder %v1861_v10, inf  ;;  %v1892_v48 = vand.u32 2147483648, %v1861_v10  ;;  %vm1891_vm2 = vcmp.eq.f32.partialorder %v1861_v10, 0.0 }
 0x508   : > { %v1869_v16 = vsel %vm1868_vm11, %v1858_v56, %v1867_v9  ;;  %v1874_v55 = vmul.f32 %v2115_v14, %v1859_v2  ;;  %v670_v56 = vadd.f32 %v2697_v41, %v563_v60  ;;  %v1957_v20 = vrot.slane %v672_v8, 4 }
 0x509   : > { %v1872_v17 = vsel %vm1870_vm12, %v1871_v13, %v1869_v16 }
 0x50a   : > { %v1922_v19 = vmul.f32 %v1872_v17, %v2674_v31  ;;  %v1853_v21 = vpop.f32.mrf.mxu0  ;;  %v1876_v22 = vsel %vm1875_vm13, %v1859_v2, %v1874_v55  ;;  %v1956_v4 = vrot.slane %v670_v56, 4 }
 0x50b   : > { %v1854_v35 = vadd.f32 %v1853_v21, %v1544_v62  ;;  %v1879_v25 = vsel %vm1877_vm14, %v1878_v59, %v1876_v22 }
 0x50c   : > { %v1930_v24 = vadd.f32 %v1922_v19, %v664_v18  ;;  %v1782_v27 = vpop.f32.mrf.mxu1  ;;  %v1855_v26 = vpop.f32.mrf.mxu0  ;;  %v1923_v39 = vmul.f32 %v1879_v25, %v2676_v43 }
 0x50d   : > { %v1864_v47 = vmax.f32 %v1854_v35, 0.0  ;;  %v1783_v29 = vadd.f32 %v1782_v27, %v1544_v62  ;;  %v1856_v30 = vadd.f32 %v1855_v26, %v1544_v62 }
 0x50e   : > { %1932 = vst [vmem:[%s2734_s17] sm:$0xf] %v1930_v24  ;;  %v1784_v31 = vpop.f32.mrf.mxu1  ;;  %v1931_v33 = vadd.f32 %v1923_v39, %v666_v23 }
 0x50f   : > { %2120 = vrsqrt.f32 %v1864_v47  ;;  %v1862_v36 = vmax.f32 %v1783_v29, 0.0  ;;  %v1865_v50 = vmax.f32 %v1856_v30, 0.0  ;;  %v1785_v12 = vadd.f32 %v1784_v31, %v1544_v62 }
 0x510   : > { %1933 = vst [vmem:[%s2734_s17 + $0x8] sm:$0xf] %v1931_v33  ;;  %v1937_v62 = vrot.slane %v666_v23, 4  ;;  %vm1910_vm6 = vcmp.eq.f32.partialorder %v1864_v47, inf  ;;  %vm1912_vm7 = vcmp.eq.f32.partialorder %v1864_v47, 0.0 }
 0x511   : > { %2122 = vrsqrt.f32 %v1862_v36  ;;  %v2740_v42 = vmax.f32 %v1785_v12, 0.0  ;;  %vm1896_vm8 = vcmp.eq.f32.partialorder %v1862_v36, inf  ;;  %v1899_v41 = vand.u32 2147483648, %v1862_v36 }
 0x512   : > { %v2117_v37 = vpop.eup %2116  ;;  %2124 = vrsqrt.f32 %v1865_v50  ;;  %vm1898_vm9 = vcmp.eq.f32.partialorder %v1862_v36, 0.0  ;;  %vm1917_vm10 = vcmp.eq.f32.partialorder %v1865_v50, inf  ;;  %v1920_v14 = vand.u32 2147483648, %v1865_v50 }
 0x513   : > { %v1881_v34 = vmul.f32 %v2117_v37, %v1860_v7  ;;  %2126 = vrsqrt.f32 %v2740_v42  ;;  %vm1919_vm3 = vcmp.eq.f32.partialorder %v1865_v50, 0.0  ;;  %vm1903_vm4 = vcmp.eq.f32.partialorder %v2740_v42, inf }
 0x514   : > { %v2119_v43 = vpop.eup %2118  ;;  %v1906_v35 = vand.u32 2147483648, %v2740_v42  ;;  %vm1905_vm5 = vcmp.eq.f32.partialorder %v2740_v42, 0.0 }
 0x515   : > { %v1883_v45 = vsel %vm1882_vm15, %v1860_v7, %v1881_v34  ;;  %v1888_v49 = vmul.f32 %v2119_v43, %v1861_v10 }
 0x516   : > { %v1886_v46 = vsel %vm1884_vm0, %v1885_v38, %v1883_v45 }
 0x517   : > { %v1924_v52 = vmul.f32 %v1886_v46, %v2691_v40  ;;  %v1890_v57 = vsel %vm1889_vm1, %v1861_v10, %v1888_v49  ;;  %v1913_v40 = vand.u32 2147483648, %v1864_v47 }
 0x518   : > { %v1893_v61 = vsel %vm1891_vm2, %v1892_v48, %v1890_v57 }
 0x519   : > { %v1940_v1 = vadd.f32 %v1936_v15, %v1924_v52  ;;  %v1925_v63 = vmul.f32 %v1893_v61, %v2693_v44 }
 0x51b   : > { %v1944_v32 = vrot.slane %v1940_v1, 4  ;;  %v1941_v5 = vadd.f32 %v1937_v62, %v1925_v63 }
 0x51c   : > { %v2121_v0 = vpop.eup %2120 }
 0x51d   : > { %1948 = vst [vmem:[%s2734_s17] sm:$0xf0] %v1944_v32  ;;  %v1909_v2 = vmul.f32 %v2121_v0, %v1864_v47  ;;  %v1945_v3 = vrot.slane %v1941_v5, 4 }
 0x51e   : > { %v2123_v28 = vpop.eup %2122 }
 0x51f   : > { %v1911_v6 = vsel %vm1910_vm6, %v1864_v47, %v1909_v2  ;;  %v2125_v7 = vpop.eup %2124  ;;  %1949 = vst [vmem:[%s2734_s17 + $0x8] sm:$0xf0] %v1945_v3  ;;  %v1895_v9 = vmul.f32 %v2123_v28, %v1862_v36 }
 0x520   : > { %v1914_v44 = vsel %vm1912_vm7, %v1913_v40, %v1911_v6  ;;  %v1916_v11 = vmul.f32 %v2125_v7, %v1865_v50  ;;  %v2127_v16 = vpop.eup %2126 }
 0x521   : > { %v1928_v10 = vmul.f32 %v1914_v44, %v2707_v51  ;;  %v1897_v13 = vsel %vm1896_vm8, %v1862_v36, %v1895_v9  ;;  %v1902_v51 = vmul.f32 %v2127_v16, %v2740_v42 }
 0x522   : > { %v1900_v55 = vsel %vm1898_vm9, %v1899_v41, %v1897_v13  ;;  %v1918_v18 = vsel %vm1917_vm10, %v1865_v50, %v1916_v11 }
 0x523   : > { %v1960_v17 = vadd.f32 %v1956_v4, %v1928_v10  ;;  %v1926_v19 = vmul.f32 %v1900_v55, %v2711_v54  ;;  %v1921_v59 = vsel %vm1919_vm3, %v1920_v14, %v1918_v18  ;;  %v1904_v24 = vsel %vm1903_vm4, %v2740_v42, %v1902_v51 }
 0x524   : > { %v1929_v22 = vmul.f32 %v1921_v59, %v2709_v53  ;;  %v1907_v54 = vsel %vm1905_vm5, %v1906_v35, %v1904_v24 }
 0x525   : > { %v1964_v21 = vrot.slane %v1960_v17, 4  ;;  %v1950_v23 = vadd.f32 %v1926_v19, %v670_v56  ;;  %v1927_v27 = vmul.f32 %v1907_v54, %v2715_v58 }
 0x526   : > { %v1961_v25 = vadd.f32 %v1957_v20, %v1929_v22 }
 0x527   : > { %1968 = vst [vmem:[%s2734_s17 + $0x10] sm:$0xf0] %v1964_v21  ;;  %1952 = vst [vmem:[%s2734_s17 + $0x10] sm:$0xf] %v1950_v23  ;;  %v1951_v39 = vadd.f32 %v1927_v27, %v672_v8 }
 0x528   : > { %v1965_v26 = vrot.slane %v1961_v25, 4 }
 0x529   : > { %1953 = vst [vmem:[%s2734_s17 + $0x18] sm:$0xf] %v1951_v39 }
 0x52a   : > { %1969 = vst [vmem:[%s2734_s17 + $0x18] sm:$0xf0] %v1965_v26 }
 0x52b PF: > { %s18_s27 = sadd.s32 1, %s2134_s27  }
 0x52c   : > { %p15_p4 = scmp.ge.s32.totalorder %s18_s27, 4  }
 0x52e   :  { %17 = sbr.rel (!%p15_p4) target bundleno = 1 (0x1), region = 86 }

</bundles_post_ra>
